<compile_context>
chip_gen: v6e
topology: v6e:2x2x1
jax: 0.10.0
libtpu: 0.0.40
codegen_flags: <defaults>
</compile_context>

<pallas_src>
import functools

import jax
import jax.numpy as jnp
from jax.experimental import pallas as pl
from jax.experimental.pallas import tpu as pltpu


def _layer_norm(x, gamma, beta, eps=1e-5):
    # One-pass stats: E[x^2] - mean^2 -> single cross-lane reduction pair per row.
    m = jnp.mean(x, axis=-1, keepdims=True)
    ms = jnp.mean(x * x, axis=-1, keepdims=True)
    var = jnp.maximum(ms - m * m, 0.0)
    return (x - m) * jax.lax.rsqrt(var + eps) * gamma + beta


def _block_kernel(n_head, heads_per_group, mlp_chunk,
                  x_ref,
                  in_w_ref, in_b_ref, out_w_ref, out_b_ref,
                  ln1_g_ref, ln1_b_ref, ln2_g_ref, ln2_b_ref,
                  fc_w_ref, fc_b_ref, pj_w_ref, pj_b_ref,
                  o_ref,
                  ctx_ref):
    # x_ref: (L, E) for the current batch element (batch dim squeezed); f32 residual.
    x = x_ref[...].astype(jnp.float32)
    L, E = x.shape
    hd = E // n_head
    gw = heads_per_group * hd            # group (slab) width; 128 at production hd=64
    n_groups = n_head // heads_per_group

    # ---- x = x + MHA(LN1(x)) ----
    h = _layer_norm(x, ln1_g_ref[...], ln1_b_ref[...]).astype(jnp.bfloat16)
    # qkv projection: bf16 x bf16 -> f32 accumulate; 1/sqrt(hd) already folded into q.
    qkv = jnp.dot(h, in_w_ref[...], preferred_element_type=jnp.float32) + in_b_ref[...]
    qkv = qkv.astype(jnp.bfloat16)       # one wide, lane-dense cast (review item)

    for g in range(n_groups):            # static loop over lane-aligned head groups
        q_slab = qkv[:,         g * gw:        (g + 1) * gw]
        k_slab = qkv[:,     E + g * gw:     E + (g + 1) * gw]
        v_slab = qkv[:, 2 * E + g * gw: 2 * E + (g + 1) * gw]
        parts = []
        for j in range(heads_per_group):
            q = q_slab[:, j * hd:(j + 1) * hd]
            k = k_slab[:, j * hd:(j + 1) * hd]
            v = v_slab[:, j * hd:(j + 1) * hd]
            # scores: contract head_dim of both operands (A @ B^T form, MXU-native)
            s = jax.lax.dot_general(q, k, (((1,), (1,)), ((), ())),
                                    preferred_element_type=jnp.float32)  # (L, L) f32
            s = s - jnp.max(s, axis=-1, keepdims=True)
            p = jnp.exp(s)                                               # unnormalized
            inv_l = pl.reciprocal(jnp.sum(p, axis=-1, keepdims=True), approx=True)
            ctx = jnp.dot(p.astype(jnp.bfloat16), v,
                          preferred_element_type=jnp.float32) * inv_l    # (L, hd) f32
            parts.append(ctx.astype(jnp.bfloat16))
        slab = parts[0] if len(parts) == 1 else jnp.concatenate(parts, axis=-1)
        ctx_ref[:, g * gw:(g + 1) * gw] = slab       # lane-dense slab store (bf16)

    attn = jnp.dot(ctx_ref[...], out_w_ref[...],
                   preferred_element_type=jnp.float32) + out_b_ref[...]
    x = x + attn

    # ---- x = x + MLP(LN2(x)) ----  (hidden dim tiled: no (L,4E) live intermediates)
    h2 = _layer_norm(x, ln2_g_ref[...], ln2_b_ref[...]).astype(jnp.bfloat16)
    n_ff = fc_w_ref.shape[1]
    y = None
    for c0 in range(0, n_ff, mlp_chunk):
        u = jnp.dot(h2, fc_w_ref[:, c0:c0 + mlp_chunk],
                    preferred_element_type=jnp.float32)
        u = u + fc_b_ref[:, c0:c0 + mlp_chunk]                 # (L, chunk) f32
        u = (u * jax.nn.sigmoid(1.702 * u)).astype(jnp.bfloat16)   # QuickGELU
        part = jnp.dot(u, pj_w_ref[c0:c0 + mlp_chunk, :],
                       preferred_element_type=jnp.float32)
        y = part if y is None else y + part
    y = y + pj_b_ref[...]

    o_ref[...] = (x + y).astype(o_ref.dtype)


# ----------------------------------------------------------------------------- setup


def prepare_weights(params, n_head):
    """Pre-transpose to MXU orientation, cast to bf16, fold the 1/sqrt(hd) q scale.

    Call once per model/block (hoisted out of the per-forward path)."""
    E = params["out_proj_w"].shape[0]
    hd = E // n_head
    scale = 1.0 / (hd ** 0.5)
    qscale = jnp.concatenate(
        [jnp.full((E,), scale, jnp.float32), jnp.ones((2 * E,), jnp.float32)])
    in_w = (params["in_proj_w"].T * qscale[None, :]).astype(jnp.bfloat16)   # (E, 3E)
    in_b = (params["in_proj_b"] * qscale[None, :]).astype(jnp.float32)      # (1, 3E)
    out_w = params["out_proj_w"].T.astype(jnp.bfloat16)                     # (E, E)
    fc_w = params["fc_w"].T.astype(jnp.bfloat16)                            # (E, 4E)
    pj_w = params["proj_w"].T.astype(jnp.bfloat16)                          # (4E, E)
    return (in_w, in_b, out_w, params["out_proj_b"],
            params["ln1_g"], params["ln1_b"], params["ln2_g"], params["ln2_b"],
            fc_w, params["fc_b"], pj_w, params["proj_b"])


def _heads_per_group(n_head, hd):
    # Group heads into exactly-128-lane slabs when head_dim allows it (pairs at 64).
    if hd < 128 and 128 % hd == 0 and n_head % (128 // hd) == 0:
        return 128 // hd
    return 1


def _mlp_chunk(n_ff):
    for c in (1024, 512, 256, 128):
        if n_ff % c == 0:
            return c
    return n_ff


def _vmem_limit_bytes():
    # ~7/8 of physical VMEM, capped at 100 MiB: ~100 MiB on v5e/v6e (128 MiB phys),
    # ~56 MiB on v7x (64 MiB phys). Raises the 16/32 MiB scoped defaults.
    try:
        cap = int(pltpu.get_tpu_info().vmem_capacity_bytes)
    except Exception:
        cap = 64 * 1024 * 1024
    return min(cap * 7 // 8, 100 * 1024 * 1024)


def _build_call(L, N, E, dtype, n_head, heads_per_group, mlp_chunk, weights,
                single_buffer_weights):
    def weight_spec(w):
        kwargs = {}
        if single_buffer_weights:
            # Grid-invariant blocks: double-buffering only doubles VMEM usage.
            kwargs["pipeline_mode"] = pl.Buffered(buffer_count=1)
        return pl.BlockSpec(w.shape, lambda b, _nd=w.ndim: (0,) * _nd, **kwargs)

    flops = int(N * (24 * L * E * E + 4 * L * L * E))
    transcendentals = int(N * (n_head * L * L + 4 * L * E + n_head * L + 2 * L))
    bytes_accessed = int(2 * N * L * E * 4 + 2 * 12 * E * E + 4 * (12 * E + 8 * E))
    cost = pl.CostEstimate(flops=flops, transcendentals=transcendentals,
                           bytes_accessed=bytes_accessed)

    return pl.pallas_call(
        functools.partial(_block_kernel, n_head, heads_per_group, mlp_chunk),
        out_shape=jax.ShapeDtypeStruct((N, L, E), dtype),
        grid=(N,),
        in_specs=[pl.BlockSpec((None, L, E), lambda b: (b, 0, 0))]
                 + [weight_spec(w) for w in weights],
        out_specs=pl.BlockSpec((None, L, E), lambda b: (b, 0, 0)),
        scratch_shapes=[pltpu.VMEM((L, E), jnp.bfloat16)],   # bf16 context scratch
        compiler_params=pltpu.CompilerParams(
            dimension_semantics=("parallel",),
            vmem_limit_bytes=_vmem_limit_bytes()),
        cost_estimate=cost,
    )


def residual_attention_block_nle(x_nle, weights, n_head):
    """Core entry point: x (N, L, E) batch-major; weights from prepare_weights()."""
    N, L, E = x_nle.shape
    assert E % n_head == 0
    hd = E // n_head
    hpg = _heads_per_group(n_head, hd)
    chunk = _mlp_chunk(4 * E)
    try:
        call = _build_call(L, N, E, x_nle.dtype, n_head, hpg, chunk, weights, True)
        return call(x_nle, *weights)
    except Exception:
        # Fallback for jax builds that reject single-buffered (Buffered(1)) specs.
        call = _build_call(L, N, E, x_nle.dtype, n_head, hpg, chunk, weights, False)
        return call(x_nle, *weights)


def residual_attention_block(x, params, n_head):
    """PyTorch-layout wrapper: x is (L, N, E) like nn.MultiheadAttention.

    For stacked layers, call prepare_weights() once per block and keep the
    residual stream in (N, L, E) between blocks (residual_attention_block_nle),
    so the two HBM layout transposes below happen once per model, not per block."""
    weights = prepare_weights(params, n_head)
    xb = jnp.transpose(x, (1, 0, 2))                 # (N, L, E)
    out = residual_attention_block_nle(xb, weights, n_head)
    return jnp.transpose(out, (1, 0, 2))             # back to (L, N, E)


# -------------------------------------------------------------------------- reference


def _reference(x, params, n_head):
    """Pure-JAX f32 reference mirroring the PyTorch forward exactly."""
    L, N, E = x.shape
    hd = E // n_head

    def ln(h, g, b):
        m = jnp.mean(h, axis=-1, keepdims=True)
        v = jnp.mean((h - m) ** 2, axis=-1, keepdims=True)
        return (h - m) * jax.lax.rsqrt(v + 1e-5) * g + b

    h = ln(x, params["ln1_g"], params["ln1_b"])
    qkv = jnp.einsum("lne,fe->lnf", h, params["in_proj_w"]) + params["in_proj_b"]
    q, k, v = jnp.split(qkv, 3, axis=-1)
    q = q.reshape(L, N, n_head, hd) * (hd ** -0.5)
    k = k.reshape(L, N, n_head, hd)
    v = v.reshape(L, N, n_head, hd)
    s = jnp.einsum("lnhd,mnhd->nhlm", q, k)
    p = jax.nn.softmax(s, axis=-1)
    ctx = jnp.einsum("nhlm,mnhd->lnhd", p, v).reshape(L, N, E)
    attn_out = jnp.einsum("lne,fe->lnf", ctx, params["out_proj_w"]) + params["out_proj_b"]
    x = x + attn_out

    h2 = ln(x, params["ln2_g"], params["ln2_b"])
    u = jnp.einsum("lne,fe->lnf", h2, params["fc_w"]) + params["fc_b"]
    u = u * jax.nn.sigmoid(1.702 * u)
    y = jnp.einsum("lnf,ef->lne", u, params["proj_w"]) + params["proj_b"]
    return x + y


def make_params(key, d_model):
    E = d_model
    ks = jax.random.split(key, 6)
    s = 0.02
    return {
        "in_proj_w":  s * jax.random.normal(ks[0], (3 * E, E), jnp.float32),
        "in_proj_b":  s * jax.random.normal(ks[1], (1, 3 * E), jnp.float32),
        "out_proj_w": s * jax.random.normal(ks[2], (E, E), jnp.float32),
        "out_proj_b": s * jax.random.normal(ks[3], (1, E), jnp.float32),
        "ln1_g": jnp.ones((1, E), jnp.float32),
        "ln1_b": jnp.zeros((1, E), jnp.float32),
        "ln2_g": jnp.ones((1, E), jnp.float32),
        "ln2_b": jnp.zeros((1, E), jnp.float32),
        "fc_w":   s * jax.random.normal(ks[4], (4 * E, E), jnp.float32),
        "fc_b":   jnp.zeros((1, 4 * E), jnp.float32),
        "proj_w": s * jax.random.normal(ks[5], (E, 4 * E), jnp.float32),
        "proj_b": jnp.zeros((1, E), jnp.float32),
    }


if __name__ == "__main__":
    # Small shapes: seq=8, batch=2, d_model=32, heads=4
    L, N, E, n_head = 8, 2, 32, 4
    key = jax.random.PRNGKey(0)
    kx, kp = jax.random.split(key)
    x = jax.random.normal(kx, (L, N, E), jnp.float32)
    params = make_params(kp, E)

    out = residual_attention_block(x, params, n_head)
    out = jax.block_until_ready(out)

    ref = _reference(x, params, n_head)
    assert out.shape == (L, N, E)
    # bf16 MXU inputs with f32 accumulation -> looser tolerance than pure f32.
    assert jnp.allclose(out, ref, atol=2e-2, rtol=2e-2), "mismatch vs reference"

    print("KERNEL_OK")
</pallas_src>

<mosaic_0001>
module attributes {stable_mosaic.version = 11 : i64} {
  func.func @_block_kernel(%arg0: i32, %arg1: memref<1x8x32xf32, #tpu.memory_space<vmem>>, %arg2: memref<32x96xbf16, #tpu.memory_space<vmem>>, %arg3: memref<1x96xf32, #tpu.memory_space<vmem>>, %arg4: memref<32x32xbf16, #tpu.memory_space<vmem>>, %arg5: memref<1x32xf32, #tpu.memory_space<vmem>>, %arg6: memref<1x32xf32, #tpu.memory_space<vmem>>, %arg7: memref<1x32xf32, #tpu.memory_space<vmem>>, %arg8: memref<1x32xf32, #tpu.memory_space<vmem>>, %arg9: memref<1x32xf32, #tpu.memory_space<vmem>>, %arg10: memref<32x128xbf16, #tpu.memory_space<vmem>>, %arg11: memref<1x128xf32, #tpu.memory_space<vmem>>, %arg12: memref<128x32xbf16, #tpu.memory_space<vmem>>, %arg13: memref<1x32xf32, #tpu.memory_space<vmem>>, %arg14: memref<1x8x32xf32, #tpu.memory_space<vmem>>, %arg15: memref<8x32xbf16, #tpu.memory_space<vmem>>) attributes {dimension_semantics = [#tpu.dimension_semantics<parallel>], iteration_bounds = array<i64: 2>, scalar_prefetch = 0 : i64, scratch_operands = 1 : i64, tpu.core_type = #tpu.core_type<tc>, window_params = [{transform_indices = @transform_0, window_bounds = array<i64: 1, 8, 32>}, {pipeline_mode = #tpu.pipeline_mode<synchronous>, transform_indices = @transform_1, window_bounds = array<i64: 32, 96>}, {pipeline_mode = #tpu.pipeline_mode<synchronous>, transform_indices = @transform_2, window_bounds = array<i64: 1, 96>}, {pipeline_mode = #tpu.pipeline_mode<synchronous>, transform_indices = @transform_3, window_bounds = array<i64: 32, 32>}, {pipeline_mode = #tpu.pipeline_mode<synchronous>, transform_indices = @transform_4, window_bounds = array<i64: 1, 32>}, {pipeline_mode = #tpu.pipeline_mode<synchronous>, transform_indices = @transform_5, window_bounds = array<i64: 1, 32>}, {pipeline_mode = #tpu.pipeline_mode<synchronous>, transform_indices = @transform_6, window_bounds = array<i64: 1, 32>}, {pipeline_mode = #tpu.pipeline_mode<synchronous>, transform_indices = @transform_7, window_bounds = array<i64: 1, 32>}, {pipeline_mode = #tpu.pipeline_mode<synchronous>, transform_indices = @transform_8, window_bounds = array<i64: 1, 32>}, {pipeline_mode = #tpu.pipeline_mode<synchronous>, transform_indices = @transform_9, window_bounds = array<i64: 32, 128>}, {pipeline_mode = #tpu.pipeline_mode<synchronous>, transform_indices = @transform_10, window_bounds = array<i64: 1, 128>}, {pipeline_mode = #tpu.pipeline_mode<synchronous>, transform_indices = @transform_11, window_bounds = array<i64: 128, 32>}, {pipeline_mode = #tpu.pipeline_mode<synchronous>, transform_indices = @transform_12, window_bounds = array<i64: 1, 32>}, {transform_indices = @transform_13, window_bounds = array<i64: 1, 8, 32>}]} {
    %c0 = arith.constant 0 : index
    %c0_0 = arith.constant 0 : index
    %c0_1 = arith.constant 0 : index
    %0 = vector.load %arg1[%c0, %c0_0, %c0_1] : memref<1x8x32xf32, #tpu.memory_space<vmem>>, vector<1x8x32xf32>
    %1 = vector.shape_cast %0 : vector<1x8x32xf32> to vector<8x32xf32>
    %c0_2 = arith.constant 0 : index
    %c0_3 = arith.constant 0 : index
    %2 = vector.load %arg6[%c0_2, %c0_3] : memref<1x32xf32, #tpu.memory_space<vmem>>, vector<1x32xf32>
    %c0_4 = arith.constant 0 : index
    %c0_5 = arith.constant 0 : index
    %3 = vector.load %arg7[%c0_4, %c0_5] : memref<1x32xf32, #tpu.memory_space<vmem>>, vector<1x32xf32>
    %cst = arith.constant dense<0.000000e+00> : vector<8xf32>
    %4 = vector.multi_reduction <add>, %1, %cst [1] : vector<8x32xf32> to vector<8xf32>
    %5 = vector.shape_cast %4 : vector<8xf32> to vector<8x1xf32>
    %cst_6 = arith.constant 3.200000e+01 : f32
    %6 = vector.broadcast %cst_6 : f32 to vector<8x1xf32>
    %7 = arith.divf %5, %6 : vector<8x1xf32>
    %8 = arith.mulf %1, %1 : vector<8x32xf32>
    %cst_7 = arith.constant dense<0.000000e+00> : vector<8xf32>
    %9 = vector.multi_reduction <add>, %8, %cst_7 [1] : vector<8x32xf32> to vector<8xf32>
    %10 = vector.shape_cast %9 : vector<8xf32> to vector<8x1xf32>
    %cst_8 = arith.constant 3.200000e+01 : f32
    %11 = vector.broadcast %cst_8 : f32 to vector<8x1xf32>
    %12 = arith.divf %10, %11 : vector<8x1xf32>
    %13 = arith.mulf %7, %7 : vector<8x1xf32>
    %14 = arith.subf %12, %13 : vector<8x1xf32>
    %cst_9 = arith.constant 0.000000e+00 : f32
    %15 = vector.broadcast %cst_9 : f32 to vector<8x1xf32>
    %16 = arith.maximumf %14, %15 : vector<8x1xf32>
    %17 = vector.broadcast %7 : vector<8x1xf32> to vector<8x32xf32>
    %18 = arith.subf %1, %17 : vector<8x32xf32>
    %cst_10 = arith.constant 9.99999974E-6 : f32
    %19 = vector.broadcast %cst_10 : f32 to vector<8x1xf32>
    %20 = arith.addf %16, %19 : vector<8x1xf32>
    %21 = math.rsqrt %20 : vector<8x1xf32>
    %22 = vector.broadcast %21 : vector<8x1xf32> to vector<8x32xf32>
    %23 = arith.mulf %18, %22 : vector<8x32xf32>
    %24 = vector.broadcast %2 : vector<1x32xf32> to vector<8x32xf32>
    %25 = arith.mulf %23, %24 : vector<8x32xf32>
    %26 = vector.broadcast %3 : vector<1x32xf32> to vector<8x32xf32>
    %27 = arith.addf %25, %26 : vector<8x32xf32>
    %28 = arith.truncf %27 : vector<8x32xf32> to vector<8x32xbf16>
    %c0_11 = arith.constant 0 : index
    %c0_12 = arith.constant 0 : index
    %29 = vector.load %arg2[%c0_11, %c0_12] : memref<32x96xbf16, #tpu.memory_space<vmem>>, vector<32x96xbf16>
    %cst_13 = arith.constant dense<0.000000e+00> : vector<8x96xf32>
    %30 = tpu.matmul %28, %29, %cst_13 {dimension_numbers = #tpu.dot_dimension_numbers<[1], [0], [0], [1], [0, 0, 1, 1], [], []>} : vector<8x32xbf16>, vector<32x96xbf16>, vector<8x96xf32> -> vector<8x96xf32>
    %c0_14 = arith.constant 0 : index
    %c0_15 = arith.constant 0 : index
    %31 = vector.load %arg3[%c0_14, %c0_15] : memref<1x96xf32, #tpu.memory_space<vmem>>, vector<1x96xf32>
    %32 = vector.broadcast %31 : vector<1x96xf32> to vector<8x96xf32>
    %33 = arith.addf %30, %32 : vector<8x96xf32>
    %34 = arith.truncf %33 : vector<8x96xf32> to vector<8x96xbf16>
    %35 = vector.extract_strided_slice %34 {offsets = [0, 0], sizes = [8, 8], strides = [1, 1]} : vector<8x96xbf16> to vector<8x8xbf16>
    %36 = vector.extract_strided_slice %34 {offsets = [0, 32], sizes = [8, 8], strides = [1, 1]} : vector<8x96xbf16> to vector<8x8xbf16>
    %37 = vector.extract_strided_slice %34 {offsets = [0, 64], sizes = [8, 8], strides = [1, 1]} : vector<8x96xbf16> to vector<8x8xbf16>
    %cst_16 = arith.constant dense<0.000000e+00> : vector<8x8xf32>
    %38 = tpu.matmul %35, %36, %cst_16 {dimension_numbers = #tpu.dot_dimension_numbers<[1], [1], [0], [0], [0, 0, 1, 0], [], []>} : vector<8x8xbf16>, vector<8x8xbf16>, vector<8x8xf32> -> vector<8x8xf32>
    %cst_17 = arith.constant dense<0xFF800000> : vector<8xf32>
    %39 = vector.multi_reduction <maximumf>, %38, %cst_17 [1] : vector<8x8xf32> to vector<8xf32>
    %40 = vector.shape_cast %39 : vector<8xf32> to vector<8x1xf32>
    %41 = vector.broadcast %40 : vector<8x1xf32> to vector<8x8xf32>
    %42 = arith.subf %38, %41 : vector<8x8xf32>
    %43 = math.exp %42 : vector<8x8xf32>
    %cst_18 = arith.constant dense<0.000000e+00> : vector<8xf32>
    %44 = vector.multi_reduction <add>, %43, %cst_18 [1] : vector<8x8xf32> to vector<8xf32>
    %45 = vector.shape_cast %44 : vector<8xf32> to vector<8x1xf32>
    %46 = tpu.reciprocal %45 {approx = true} : vector<8x1xf32> -> vector<8x1xf32>
    %47 = arith.truncf %43 : vector<8x8xf32> to vector<8x8xbf16>
    %cst_19 = arith.constant dense<0.000000e+00> : vector<8x8xf32>
    %48 = tpu.matmul %47, %37, %cst_19 {dimension_numbers = #tpu.dot_dimension_numbers<[1], [0], [0], [1], [0, 0, 1, 1], [], []>} : vector<8x8xbf16>, vector<8x8xbf16>, vector<8x8xf32> -> vector<8x8xf32>
    %49 = vector.broadcast %46 : vector<8x1xf32> to vector<8x8xf32>
    %50 = arith.mulf %48, %49 : vector<8x8xf32>
    %51 = arith.truncf %50 : vector<8x8xf32> to vector<8x8xbf16>
    %c0_20 = arith.constant 0 : index
    %c0_21 = arith.constant 0 : index
    %52 = vector.load %arg15[%c0_20, %c0_21] : memref<8x32xbf16, #tpu.memory_space<vmem>>, vector<8x8xbf16>
    tpu.vector_store %arg15[%c0_20, %c0_21], %51 {strides = array<i32>} : memref<8x32xbf16, #tpu.memory_space<vmem>>, vector<8x8xbf16>,
    %53 = vector.extract_strided_slice %34 {offsets = [0, 8], sizes = [8, 8], strides = [1, 1]} : vector<8x96xbf16> to vector<8x8xbf16>
    %54 = vector.extract_strided_slice %34 {offsets = [0, 40], sizes = [8, 8], strides = [1, 1]} : vector<8x96xbf16> to vector<8x8xbf16>
    %55 = vector.extract_strided_slice %34 {offsets = [0, 72], sizes = [8, 8], strides = [1, 1]} : vector<8x96xbf16> to vector<8x8xbf16>
    %cst_22 = arith.constant dense<0.000000e+00> : vector<8x8xf32>
    %56 = tpu.matmul %53, %54, %cst_22 {dimension_numbers = #tpu.dot_dimension_numbers<[1], [1], [0], [0], [0, 0, 1, 0], [], []>} : vector<8x8xbf16>, vector<8x8xbf16>, vector<8x8xf32> -> vector<8x8xf32>
    %cst_23 = arith.constant dense<0xFF800000> : vector<8xf32>
    %57 = vector.multi_reduction <maximumf>, %56, %cst_23 [1] : vector<8x8xf32> to vector<8xf32>
    %58 = vector.shape_cast %57 : vector<8xf32> to vector<8x1xf32>
    %59 = vector.broadcast %58 : vector<8x1xf32> to vector<8x8xf32>
    %60 = arith.subf %56, %59 : vector<8x8xf32>
    %61 = math.exp %60 : vector<8x8xf32>
    %cst_24 = arith.constant dense<0.000000e+00> : vector<8xf32>
    %62 = vector.multi_reduction <add>, %61, %cst_24 [1] : vector<8x8xf32> to vector<8xf32>
    %63 = vector.shape_cast %62 : vector<8xf32> to vector<8x1xf32>
    %64 = tpu.reciprocal %63 {approx = true} : vector<8x1xf32> -> vector<8x1xf32>
    %65 = arith.truncf %61 : vector<8x8xf32> to vector<8x8xbf16>
    %cst_25 = arith.constant dense<0.000000e+00> : vector<8x8xf32>
    %66 = tpu.matmul %65, %55, %cst_25 {dimension_numbers = #tpu.dot_dimension_numbers<[1], [0], [0], [1], [0, 0, 1, 1], [], []>} : vector<8x8xbf16>, vector<8x8xbf16>, vector<8x8xf32> -> vector<8x8xf32>
    %67 = vector.broadcast %64 : vector<8x1xf32> to vector<8x8xf32>
    %68 = arith.mulf %66, %67 : vector<8x8xf32>
    %69 = arith.truncf %68 : vector<8x8xf32> to vector<8x8xbf16>
    %c0_26 = arith.constant 0 : index
    %c8 = arith.constant 8 : index
    %70 = vector.load %arg15[%c0_26, %c8] : memref<8x32xbf16, #tpu.memory_space<vmem>>, vector<8x8xbf16>
    tpu.vector_store %arg15[%c0_26, %c8], %69 {strides = array<i32>} : memref<8x32xbf16, #tpu.memory_space<vmem>>, vector<8x8xbf16>,
    %71 = vector.extract_strided_slice %34 {offsets = [0, 16], sizes = [8, 8], strides = [1, 1]} : vector<8x96xbf16> to vector<8x8xbf16>
    %72 = vector.extract_strided_slice %34 {offsets = [0, 48], sizes = [8, 8], strides = [1, 1]} : vector<8x96xbf16> to vector<8x8xbf16>
    %73 = vector.extract_strided_slice %34 {offsets = [0, 80], sizes = [8, 8], strides = [1, 1]} : vector<8x96xbf16> to vector<8x8xbf16>
    %cst_27 = arith.constant dense<0.000000e+00> : vector<8x8xf32>
    %74 = tpu.matmul %71, %72, %cst_27 {dimension_numbers = #tpu.dot_dimension_numbers<[1], [1], [0], [0], [0, 0, 1, 0], [], []>} : vector<8x8xbf16>, vector<8x8xbf16>, vector<8x8xf32> -> vector<8x8xf32>
    %cst_28 = arith.constant dense<0xFF800000> : vector<8xf32>
    %75 = vector.multi_reduction <maximumf>, %74, %cst_28 [1] : vector<8x8xf32> to vector<8xf32>
    %76 = vector.shape_cast %75 : vector<8xf32> to vector<8x1xf32>
    %77 = vector.broadcast %76 : vector<8x1xf32> to vector<8x8xf32>
    %78 = arith.subf %74, %77 : vector<8x8xf32>
    %79 = math.exp %78 : vector<8x8xf32>
    %cst_29 = arith.constant dense<0.000000e+00> : vector<8xf32>
    %80 = vector.multi_reduction <add>, %79, %cst_29 [1] : vector<8x8xf32> to vector<8xf32>
    %81 = vector.shape_cast %80 : vector<8xf32> to vector<8x1xf32>
    %82 = tpu.reciprocal %81 {approx = true} : vector<8x1xf32> -> vector<8x1xf32>
    %83 = arith.truncf %79 : vector<8x8xf32> to vector<8x8xbf16>
    %cst_30 = arith.constant dense<0.000000e+00> : vector<8x8xf32>
    %84 = tpu.matmul %83, %73, %cst_30 {dimension_numbers = #tpu.dot_dimension_numbers<[1], [0], [0], [1], [0, 0, 1, 1], [], []>} : vector<8x8xbf16>, vector<8x8xbf16>, vector<8x8xf32> -> vector<8x8xf32>
    %85 = vector.broadcast %82 : vector<8x1xf32> to vector<8x8xf32>
    %86 = arith.mulf %84, %85 : vector<8x8xf32>
    %87 = arith.truncf %86 : vector<8x8xf32> to vector<8x8xbf16>
    %c0_31 = arith.constant 0 : index
    %c16 = arith.constant 16 : index
    %88 = vector.load %arg15[%c0_31, %c16] : memref<8x32xbf16, #tpu.memory_space<vmem>>, vector<8x8xbf16>
    tpu.vector_store %arg15[%c0_31, %c16], %87 {strides = array<i32>} : memref<8x32xbf16, #tpu.memory_space<vmem>>, vector<8x8xbf16>,
    %89 = vector.extract_strided_slice %34 {offsets = [0, 24], sizes = [8, 8], strides = [1, 1]} : vector<8x96xbf16> to vector<8x8xbf16>
    %90 = vector.extract_strided_slice %34 {offsets = [0, 56], sizes = [8, 8], strides = [1, 1]} : vector<8x96xbf16> to vector<8x8xbf16>
    %91 = vector.extract_strided_slice %34 {offsets = [0, 88], sizes = [8, 8], strides = [1, 1]} : vector<8x96xbf16> to vector<8x8xbf16>
    %cst_32 = arith.constant dense<0.000000e+00> : vector<8x8xf32>
    %92 = tpu.matmul %89, %90, %cst_32 {dimension_numbers = #tpu.dot_dimension_numbers<[1], [1], [0], [0], [0, 0, 1, 0], [], []>} : vector<8x8xbf16>, vector<8x8xbf16>, vector<8x8xf32> -> vector<8x8xf32>
    %cst_33 = arith.constant dense<0xFF800000> : vector<8xf32>
    %93 = vector.multi_reduction <maximumf>, %92, %cst_33 [1] : vector<8x8xf32> to vector<8xf32>
    %94 = vector.shape_cast %93 : vector<8xf32> to vector<8x1xf32>
    %95 = vector.broadcast %94 : vector<8x1xf32> to vector<8x8xf32>
    %96 = arith.subf %92, %95 : vector<8x8xf32>
    %97 = math.exp %96 : vector<8x8xf32>
    %cst_34 = arith.constant dense<0.000000e+00> : vector<8xf32>
    %98 = vector.multi_reduction <add>, %97, %cst_34 [1] : vector<8x8xf32> to vector<8xf32>
    %99 = vector.shape_cast %98 : vector<8xf32> to vector<8x1xf32>
    %100 = tpu.reciprocal %99 {approx = true} : vector<8x1xf32> -> vector<8x1xf32>
    %101 = arith.truncf %97 : vector<8x8xf32> to vector<8x8xbf16>
    %cst_35 = arith.constant dense<0.000000e+00> : vector<8x8xf32>
    %102 = tpu.matmul %101, %91, %cst_35 {dimension_numbers = #tpu.dot_dimension_numbers<[1], [0], [0], [1], [0, 0, 1, 1], [], []>} : vector<8x8xbf16>, vector<8x8xbf16>, vector<8x8xf32> -> vector<8x8xf32>
    %103 = vector.broadcast %100 : vector<8x1xf32> to vector<8x8xf32>
    %104 = arith.mulf %102, %103 : vector<8x8xf32>
    %105 = arith.truncf %104 : vector<8x8xf32> to vector<8x8xbf16>
    %c0_36 = arith.constant 0 : index
    %c24 = arith.constant 24 : index
    %106 = vector.load %arg15[%c0_36, %c24] : memref<8x32xbf16, #tpu.memory_space<vmem>>, vector<8x8xbf16>
    tpu.vector_store %arg15[%c0_36, %c24], %105 {strides = array<i32>} : memref<8x32xbf16, #tpu.memory_space<vmem>>, vector<8x8xbf16>,
    %c0_37 = arith.constant 0 : index
    %c0_38 = arith.constant 0 : index
    %107 = vector.load %arg15[%c0_37, %c0_38] : memref<8x32xbf16, #tpu.memory_space<vmem>>, vector<8x32xbf16>
    %c0_39 = arith.constant 0 : index
    %c0_40 = arith.constant 0 : index
    %108 = vector.load %arg4[%c0_39, %c0_40] : memref<32x32xbf16, #tpu.memory_space<vmem>>, vector<32x32xbf16>
    %cst_41 = arith.constant dense<0.000000e+00> : vector<8x32xf32>
    %109 = tpu.matmul %107, %108, %cst_41 {dimension_numbers = #tpu.dot_dimension_numbers<[1], [0], [0], [1], [0, 0, 1, 1], [], []>} : vector<8x32xbf16>, vector<32x32xbf16>, vector<8x32xf32> -> vector<8x32xf32>
    %c0_42 = arith.constant 0 : index
    %c0_43 = arith.constant 0 : index
    %110 = vector.load %arg5[%c0_42, %c0_43] : memref<1x32xf32, #tpu.memory_space<vmem>>, vector<1x32xf32>
    %111 = vector.broadcast %110 : vector<1x32xf32> to vector<8x32xf32>
    %112 = arith.addf %109, %111 : vector<8x32xf32>
    %113 = arith.addf %1, %112 : vector<8x32xf32>
    %c0_44 = arith.constant 0 : index
    %c0_45 = arith.constant 0 : index
    %114 = vector.load %arg8[%c0_44, %c0_45] : memref<1x32xf32, #tpu.memory_space<vmem>>, vector<1x32xf32>
    %c0_46 = arith.constant 0 : index
    %c0_47 = arith.constant 0 : index
    %115 = vector.load %arg9[%c0_46, %c0_47] : memref<1x32xf32, #tpu.memory_space<vmem>>, vector<1x32xf32>
    %cst_48 = arith.constant dense<0.000000e+00> : vector<8xf32>
    %116 = vector.multi_reduction <add>, %113, %cst_48 [1] : vector<8x32xf32> to vector<8xf32>
    %117 = vector.shape_cast %116 : vector<8xf32> to vector<8x1xf32>
    %cst_49 = arith.constant 3.200000e+01 : f32
    %118 = vector.broadcast %cst_49 : f32 to vector<8x1xf32>
    %119 = arith.divf %117, %118 : vector<8x1xf32>
    %120 = arith.mulf %113, %113 : vector<8x32xf32>
    %cst_50 = arith.constant dense<0.000000e+00> : vector<8xf32>
    %121 = vector.multi_reduction <add>, %120, %cst_50 [1] : vector<8x32xf32> to vector<8xf32>
    %122 = vector.shape_cast %121 : vector<8xf32> to vector<8x1xf32>
    %cst_51 = arith.constant 3.200000e+01 : f32
    %123 = vector.broadcast %cst_51 : f32 to vector<8x1xf32>
    %124 = arith.divf %122, %123 : vector<8x1xf32>
    %125 = arith.mulf %119, %119 : vector<8x1xf32>
    %126 = arith.subf %124, %125 : vector<8x1xf32>
    %cst_52 = arith.constant 0.000000e+00 : f32
    %127 = vector.broadcast %cst_52 : f32 to vector<8x1xf32>
    %128 = arith.maximumf %126, %127 : vector<8x1xf32>
    %129 = vector.broadcast %119 : vector<8x1xf32> to vector<8x32xf32>
    %130 = arith.subf %113, %129 : vector<8x32xf32>
    %cst_53 = arith.constant 9.99999974E-6 : f32
    %131 = vector.broadcast %cst_53 : f32 to vector<8x1xf32>
    %132 = arith.addf %128, %131 : vector<8x1xf32>
    %133 = math.rsqrt %132 : vector<8x1xf32>
    %134 = vector.broadcast %133 : vector<8x1xf32> to vector<8x32xf32>
    %135 = arith.mulf %130, %134 : vector<8x32xf32>
    %136 = vector.broadcast %114 : vector<1x32xf32> to vector<8x32xf32>
    %137 = arith.mulf %135, %136 : vector<8x32xf32>
    %138 = vector.broadcast %115 : vector<1x32xf32> to vector<8x32xf32>
    %139 = arith.addf %137, %138 : vector<8x32xf32>
    %140 = arith.truncf %139 : vector<8x32xf32> to vector<8x32xbf16>
    %c0_54 = arith.constant 0 : index
    %c0_55 = arith.constant 0 : index
    %141 = vector.load %arg10[%c0_54, %c0_55] : memref<32x128xbf16, #tpu.memory_space<vmem>>, vector<32x128xbf16>
    %cst_56 = arith.constant dense<0.000000e+00> : vector<8x128xf32>
    %142 = tpu.matmul %140, %141, %cst_56 {dimension_numbers = #tpu.dot_dimension_numbers<[1], [0], [0], [1], [0, 0, 1, 1], [], []>} : vector<8x32xbf16>, vector<32x128xbf16>, vector<8x128xf32> -> vector<8x128xf32>
    %c0_57 = arith.constant 0 : index
    %c0_58 = arith.constant 0 : index
    %143 = vector.load %arg11[%c0_57, %c0_58] : memref<1x128xf32, #tpu.memory_space<vmem>>, vector<1x128xf32>
    %144 = vector.broadcast %143 : vector<1x128xf32> to vector<8x128xf32>
    %145 = arith.addf %142, %144 : vector<8x128xf32>
    %cst_59 = arith.constant 1.702000e+00 : f32
    %146 = vector.broadcast %cst_59 : f32 to vector<8x128xf32>
    %147 = arith.mulf %146, %145 : vector<8x128xf32>
    %148 = arith.negf %147 : vector<8x128xf32>
    %149 = math.exp %148 : vector<8x128xf32>
    %cst_60 = arith.constant 1.000000e+00 : f32
    %150 = vector.broadcast %cst_60 : f32 to vector<8x128xf32>
    %151 = arith.addf %150, %149 : vector<8x128xf32>
    %152 = arith.divf %150, %151 : vector<8x128xf32>
    %153 = arith.mulf %145, %152 : vector<8x128xf32>
    %154 = arith.truncf %153 : vector<8x128xf32> to vector<8x128xbf16>
    %c0_61 = arith.constant 0 : index
    %c0_62 = arith.constant 0 : index
    %155 = vector.load %arg12[%c0_61, %c0_62] : memref<128x32xbf16, #tpu.memory_space<vmem>>, vector<128x32xbf16>
    %cst_63 = arith.constant dense<0.000000e+00> : vector<8x32xf32>
    %156 = tpu.matmul %154, %155, %cst_63 {dimension_numbers = #tpu.dot_dimension_numbers<[1], [0], [0], [1], [0, 0, 1, 1], [], []>} : vector<8x128xbf16>, vector<128x32xbf16>, vector<8x32xf32> -> vector<8x32xf32>
    %c0_64 = arith.constant 0 : index
    %c0_65 = arith.constant 0 : index
    %157 = vector.load %arg13[%c0_64, %c0_65] : memref<1x32xf32, #tpu.memory_space<vmem>>, vector<1x32xf32>
    %158 = vector.broadcast %157 : vector<1x32xf32> to vector<8x32xf32>
    %159 = arith.addf %156, %158 : vector<8x32xf32>
    %160 = arith.addf %113, %159 : vector<8x32xf32>
    %c0_66 = arith.constant 0 : index
    %c0_67 = arith.constant 0 : index
    %c0_68 = arith.constant 0 : index
    %161 = vector.load %arg14[%c0_66, %c0_67, %c0_68] : memref<1x8x32xf32, #tpu.memory_space<vmem>>, vector<1x8x32xf32>
    %162 = vector.shape_cast %161 : vector<1x8x32xf32> to vector<8x32xf32>
    %163 = vector.shape_cast %160 : vector<8x32xf32> to vector<1x8x32xf32>
    tpu.vector_store %arg14[%c0_66, %c0_67, %c0_68], %163 {strides = array<i32>} : memref<1x8x32xf32, #tpu.memory_space<vmem>>, vector<1x8x32xf32>,
    return
  }
  func.func @transform_0(%arg0: i32) -> (i32, i32, i32) {
    %c0_i32 = arith.constant 0 : i32
    %c0_i32_0 = arith.constant 0 : i32
    %c0_i32_1 = arith.constant 0 : i32
    return %arg0, %c0_i32, %c0_i32_0 : i32, i32, i32
  }
  func.func @transform_1(%arg0: i32) -> (i32, i32) {
    %c0_i32 = arith.constant 0 : i32
    %c0_i32_0 = arith.constant 0 : i32
    %c0_i32_1 = arith.constant 0 : i32
    return %c0_i32, %c0_i32_0 : i32, i32
  }
  func.func @transform_2(%arg0: i32) -> (i32, i32) {
    %c0_i32 = arith.constant 0 : i32
    %c0_i32_0 = arith.constant 0 : i32
    %c0_i32_1 = arith.constant 0 : i32
    return %c0_i32, %c0_i32_0 : i32, i32
  }
  func.func @transform_3(%arg0: i32) -> (i32, i32) {
    %c0_i32 = arith.constant 0 : i32
    %c0_i32_0 = arith.constant 0 : i32
    %c0_i32_1 = arith.constant 0 : i32
    return %c0_i32, %c0_i32_0 : i32, i32
  }
  func.func @transform_4(%arg0: i32) -> (i32, i32) {
    %c0_i32 = arith.constant 0 : i32
    %c0_i32_0 = arith.constant 0 : i32
    %c0_i32_1 = arith.constant 0 : i32
    return %c0_i32, %c0_i32_0 : i32, i32
  }
  func.func @transform_5(%arg0: i32) -> (i32, i32) {
    %c0_i32 = arith.constant 0 : i32
    %c0_i32_0 = arith.constant 0 : i32
    %c0_i32_1 = arith.constant 0 : i32
    return %c0_i32, %c0_i32_0 : i32, i32
  }
  func.func @transform_6(%arg0: i32) -> (i32, i32) {
    %c0_i32 = arith.constant 0 : i32
    %c0_i32_0 = arith.constant 0 : i32
    %c0_i32_1 = arith.constant 0 : i32
    return %c0_i32, %c0_i32_0 : i32, i32
  }
  func.func @transform_7(%arg0: i32) -> (i32, i32) {
    %c0_i32 = arith.constant 0 : i32
    %c0_i32_0 = arith.constant 0 : i32
    %c0_i32_1 = arith.constant 0 : i32
    return %c0_i32, %c0_i32_0 : i32, i32
  }
  func.func @transform_8(%arg0: i32) -> (i32, i32) {
    %c0_i32 = arith.constant 0 : i32
    %c0_i32_0 = arith.constant 0 : i32
    %c0_i32_1 = arith.constant 0 : i32
    return %c0_i32, %c0_i32_0 : i32, i32
  }
  func.func @transform_9(%arg0: i32) -> (i32, i32) {
    %c0_i32 = arith.constant 0 : i32
    %c0_i32_0 = arith.constant 0 : i32
    %c0_i32_1 = arith.constant 0 : i32
    return %c0_i32, %c0_i32_0 : i32, i32
  }
  func.func @transform_10(%arg0: i32) -> (i32, i32) {
    %c0_i32 = arith.constant 0 : i32
    %c0_i32_0 = arith.constant 0 : i32
    %c0_i32_1 = arith.constant 0 : i32
    return %c0_i32, %c0_i32_0 : i32, i32
  }
  func.func @transform_11(%arg0: i32) -> (i32, i32) {
    %c0_i32 = arith.constant 0 : i32
    %c0_i32_0 = arith.constant 0 : i32
    %c0_i32_1 = arith.constant 0 : i32
    return %c0_i32, %c0_i32_0 : i32, i32
  }
  func.func @transform_12(%arg0: i32) -> (i32, i32) {
    %c0_i32 = arith.constant 0 : i32
    %c0_i32_0 = arith.constant 0 : i32
    %c0_i32_1 = arith.constant 0 : i32
    return %c0_i32, %c0_i32_0 : i32, i32
  }
  func.func @transform_13(%arg0: i32) -> (i32, i32, i32) {
    %c0_i32 = arith.constant 0 : i32
    %c0_i32_0 = arith.constant 0 : i32
    %c0_i32_1 = arith.constant 0 : i32
    return %arg0, %c0_i32, %c0_i32_0 : i32, i32, i32
  }
}

module attributes {stable_mosaic.version = 11 : i64} {
  func.func @_block_kernel(%arg0: i32, %arg1: memref<1x8x32xf32, #tpu.memory_space<vmem>>, %arg2: memref<32x96xbf16, #tpu.memory_space<vmem>>, %arg3: memref<1x96xf32, #tpu.memory_space<vmem>>, %arg4: memref<32x32xbf16, #tpu.memory_space<vmem>>, %arg5: memref<1x32xf32, #tpu.memory_space<vmem>>, %arg6: memref<1x32xf32, #tpu.memory_space<vmem>>, %arg7: memref<1x32xf32, #tpu.memory_space<vmem>>, %arg8: memref<1x32xf32, #tpu.memory_space<vmem>>, %arg9: memref<1x32xf32, #tpu.memory_space<vmem>>, %arg10: memref<32x128xbf16, #tpu.memory_space<vmem>>, %arg11: memref<1x128xf32, #tpu.memory_space<vmem>>, %arg12: memref<128x32xbf16, #tpu.memory_space<vmem>>, %arg13: memref<1x32xf32, #tpu.memory_space<vmem>>, %arg14: memref<1x8x32xf32, #tpu.memory_space<vmem>>, %arg15: memref<8x32xbf16, #tpu.memory_space<vmem>>) attributes {dimension_semantics = [#tpu.dimension_semantics<parallel>], iteration_bounds = array<i64: 2>, scalar_prefetch = 0 : i64, scratch_operands = 1 : i64, tpu.core_type = #tpu.core_type<tc>, window_params = [{transform_indices = @transform_0, window_bounds = array<i64: 1, 8, 32>}, {pipeline_mode = #tpu.pipeline_mode<synchronous>, transform_indices = @transform_1, window_bounds = array<i64: 32, 96>}, {pipeline_mode = #tpu.pipeline_mode<synchronous>, transform_indices = @transform_2, window_bounds = array<i64: 1, 96>}, {pipeline_mode = #tpu.pipeline_mode<synchronous>, transform_indices = @transform_3, window_bounds = array<i64: 32, 32>}, {pipeline_mode = #tpu.pipeline_mode<synchronous>, transform_indices = @transform_4, window_bounds = array<i64: 1, 32>}, {pipeline_mode = #tpu.pipeline_mode<synchronous>, transform_indices = @transform_5, window_bounds = array<i64: 1, 32>}, {pipeline_mode = #tpu.pipeline_mode<synchronous>, transform_indices = @transform_6, window_bounds = array<i64: 1, 32>}, {pipeline_mode = #tpu.pipeline_mode<synchronous>, transform_indices = @transform_7, window_bounds = array<i64: 1, 32>}, {pipeline_mode = #tpu.pipeline_mode<synchronous>, transform_indices = @transform_8, window_bounds = array<i64: 1, 32>}, {pipeline_mode = #tpu.pipeline_mode<synchronous>, transform_indices = @transform_9, window_bounds = array<i64: 32, 128>}, {pipeline_mode = #tpu.pipeline_mode<synchronous>, transform_indices = @transform_10, window_bounds = array<i64: 1, 128>}, {pipeline_mode = #tpu.pipeline_mode<synchronous>, transform_indices = @transform_11, window_bounds = array<i64: 128, 32>}, {pipeline_mode = #tpu.pipeline_mode<synchronous>, transform_indices = @transform_12, window_bounds = array<i64: 1, 32>}, {transform_indices = @transform_13, window_bounds = array<i64: 1, 8, 32>}]} {
    %c0 = arith.constant 0 : index
    %c0_0 = arith.constant 0 : index
    %c0_1 = arith.constant 0 : index
    %0 = vector.load %arg1[%c0, %c0_0, %c0_1] : memref<1x8x32xf32, #tpu.memory_space<vmem>>, vector<1x8x32xf32>
    %1 = vector.shape_cast %0 : vector<1x8x32xf32> to vector<8x32xf32>
    %c0_2 = arith.constant 0 : index
    %c0_3 = arith.constant 0 : index
    %2 = vector.load %arg6[%c0_2, %c0_3] : memref<1x32xf32, #tpu.memory_space<vmem>>, vector<1x32xf32>
    %c0_4 = arith.constant 0 : index
    %c0_5 = arith.constant 0 : index
    %3 = vector.load %arg7[%c0_4, %c0_5] : memref<1x32xf32, #tpu.memory_space<vmem>>, vector<1x32xf32>
    %cst = arith.constant dense<0.000000e+00> : vector<8xf32>
    %4 = vector.multi_reduction <add>, %1, %cst [1] : vector<8x32xf32> to vector<8xf32>
    %5 = vector.shape_cast %4 : vector<8xf32> to vector<8x1xf32>
    %cst_6 = arith.constant 3.200000e+01 : f32
    %6 = vector.broadcast %cst_6 : f32 to vector<8x1xf32>
    %7 = arith.divf %5, %6 : vector<8x1xf32>
    %8 = arith.mulf %1, %1 : vector<8x32xf32>
    %cst_7 = arith.constant dense<0.000000e+00> : vector<8xf32>
    %9 = vector.multi_reduction <add>, %8, %cst_7 [1] : vector<8x32xf32> to vector<8xf32>
    %10 = vector.shape_cast %9 : vector<8xf32> to vector<8x1xf32>
    %cst_8 = arith.constant 3.200000e+01 : f32
    %11 = vector.broadcast %cst_8 : f32 to vector<8x1xf32>
    %12 = arith.divf %10, %11 : vector<8x1xf32>
    %13 = arith.mulf %7, %7 : vector<8x1xf32>
    %14 = arith.subf %12, %13 : vector<8x1xf32>
    %cst_9 = arith.constant 0.000000e+00 : f32
    %15 = vector.broadcast %cst_9 : f32 to vector<8x1xf32>
    %16 = arith.maximumf %14, %15 : vector<8x1xf32>
    %17 = vector.broadcast %7 : vector<8x1xf32> to vector<8x32xf32>
    %18 = arith.subf %1, %17 : vector<8x32xf32>
    %cst_10 = arith.constant 9.99999974E-6 : f32
    %19 = vector.broadcast %cst_10 : f32 to vector<8x1xf32>
    %20 = arith.addf %16, %19 : vector<8x1xf32>
    %21 = math.rsqrt %20 : vector<8x1xf32>
    %22 = vector.broadcast %21 : vector<8x1xf32> to vector<8x32xf32>
    %23 = arith.mulf %18, %22 : vector<8x32xf32>
    %24 = vector.broadcast %2 : vector<1x32xf32> to vector<8x32xf32>
    %25 = arith.mulf %23, %24 : vector<8x32xf32>
    %26 = vector.broadcast %3 : vector<1x32xf32> to vector<8x32xf32>
    %27 = arith.addf %25, %26 : vector<8x32xf32>
    %28 = arith.truncf %27 : vector<8x32xf32> to vector<8x32xbf16>
    %c0_11 = arith.constant 0 : index
    %c0_12 = arith.constant 0 : index
    %29 = vector.load %arg2[%c0_11, %c0_12] : memref<32x96xbf16, #tpu.memory_space<vmem>>, vector<32x96xbf16>
    %cst_13 = arith.constant dense<0.000000e+00> : vector<8x96xf32>
    %30 = tpu.matmul %28, %29, %cst_13 {dimension_numbers = #tpu.dot_dimension_numbers<[1], [0], [0], [1], [0, 0, 1, 1], [], []>} : vector<8x32xbf16>, vector<32x96xbf16>, vector<8x96xf32> -> vector<8x96xf32>
    %c0_14 = arith.constant 0 : index
    %c0_15 = arith.constant 0 : index
    %31 = vector.load %arg3[%c0_14, %c0_15] : memref<1x96xf32, #tpu.memory_space<vmem>>, vector<1x96xf32>
    %32 = vector.broadcast %31 : vector<1x96xf32> to vector<8x96xf32>
    %33 = arith.addf %30, %32 : vector<8x96xf32>
    %34 = arith.truncf %33 : vector<8x96xf32> to vector<8x96xbf16>
    %35 = vector.extract_strided_slice %34 {offsets = [0, 0], sizes = [8, 8], strides = [1, 1]} : vector<8x96xbf16> to vector<8x8xbf16>
    %36 = vector.extract_strided_slice %34 {offsets = [0, 32], sizes = [8, 8], strides = [1, 1]} : vector<8x96xbf16> to vector<8x8xbf16>
    %37 = vector.extract_strided_slice %34 {offsets = [0, 64], sizes = [8, 8], strides = [1, 1]} : vector<8x96xbf16> to vector<8x8xbf16>
    %cst_16 = arith.constant dense<0.000000e+00> : vector<8x8xf32>
    %38 = tpu.matmul %35, %36, %cst_16 {dimension_numbers = #tpu.dot_dimension_numbers<[1], [1], [0], [0], [0, 0, 1, 0], [], []>} : vector<8x8xbf16>, vector<8x8xbf16>, vector<8x8xf32> -> vector<8x8xf32>
    %cst_17 = arith.constant dense<0xFF800000> : vector<8xf32>
    %39 = vector.multi_reduction <maximumf>, %38, %cst_17 [1] : vector<8x8xf32> to vector<8xf32>
    %40 = vector.shape_cast %39 : vector<8xf32> to vector<8x1xf32>
    %41 = vector.broadcast %40 : vector<8x1xf32> to vector<8x8xf32>
    %42 = arith.subf %38, %41 : vector<8x8xf32>
    %43 = math.exp %42 : vector<8x8xf32>
    %cst_18 = arith.constant dense<0.000000e+00> : vector<8xf32>
    %44 = vector.multi_reduction <add>, %43, %cst_18 [1] : vector<8x8xf32> to vector<8xf32>
    %45 = vector.shape_cast %44 : vector<8xf32> to vector<8x1xf32>
    %46 = tpu.reciprocal %45 {approx = true} : vector<8x1xf32> -> vector<8x1xf32>
    %47 = arith.truncf %43 : vector<8x8xf32> to vector<8x8xbf16>
    %cst_19 = arith.constant dense<0.000000e+00> : vector<8x8xf32>
    %48 = tpu.matmul %47, %37, %cst_19 {dimension_numbers = #tpu.dot_dimension_numbers<[1], [0], [0], [1], [0, 0, 1, 1], [], []>} : vector<8x8xbf16>, vector<8x8xbf16>, vector<8x8xf32> -> vector<8x8xf32>
    %49 = vector.broadcast %46 : vector<8x1xf32> to vector<8x8xf32>
    %50 = arith.mulf %48, %49 : vector<8x8xf32>
    %51 = arith.truncf %50 : vector<8x8xf32> to vector<8x8xbf16>
    %c0_20 = arith.constant 0 : index
    %c0_21 = arith.constant 0 : index
    %52 = vector.load %arg15[%c0_20, %c0_21] : memref<8x32xbf16, #tpu.memory_space<vmem>>, vector<8x8xbf16>
    tpu.vector_store %arg15[%c0_20, %c0_21], %51 {strides = array<i32>} : memref<8x32xbf16, #tpu.memory_space<vmem>>, vector<8x8xbf16>,
    %53 = vector.extract_strided_slice %34 {offsets = [0, 8], sizes = [8, 8], strides = [1, 1]} : vector<8x96xbf16> to vector<8x8xbf16>
    %54 = vector.extract_strided_slice %34 {offsets = [0, 40], sizes = [8, 8], strides = [1, 1]} : vector<8x96xbf16> to vector<8x8xbf16>
    %55 = vector.extract_strided_slice %34 {offsets = [0, 72], sizes = [8, 8], strides = [1, 1]} : vector<8x96xbf16> to vector<8x8xbf16>
    %cst_22 = arith.constant dense<0.000000e+00> : vector<8x8xf32>
    %56 = tpu.matmul %53, %54, %cst_22 {dimension_numbers = #tpu.dot_dimension_numbers<[1], [1], [0], [0], [0, 0, 1, 0], [], []>} : vector<8x8xbf16>, vector<8x8xbf16>, vector<8x8xf32> -> vector<8x8xf32>
    %cst_23 = arith.constant dense<0xFF800000> : vector<8xf32>
    %57 = vector.multi_reduction <maximumf>, %56, %cst_23 [1] : vector<8x8xf32> to vector<8xf32>
    %58 = vector.shape_cast %57 : vector<8xf32> to vector<8x1xf32>
    %59 = vector.broadcast %58 : vector<8x1xf32> to vector<8x8xf32>
    %60 = arith.subf %56, %59 : vector<8x8xf32>
    %61 = math.exp %60 : vector<8x8xf32>
    %cst_24 = arith.constant dense<0.000000e+00> : vector<8xf32>
    %62 = vector.multi_reduction <add>, %61, %cst_24 [1] : vector<8x8xf32> to vector<8xf32>
    %63 = vector.shape_cast %62 : vector<8xf32> to vector<8x1xf32>
    %64 = tpu.reciprocal %63 {approx = true} : vector<8x1xf32> -> vector<8x1xf32>
    %65 = arith.truncf %61 : vector<8x8xf32> to vector<8x8xbf16>
    %cst_25 = arith.constant dense<0.000000e+00> : vector<8x8xf32>
    %66 = tpu.matmul %65, %55, %cst_25 {dimension_numbers = #tpu.dot_dimension_numbers<[1], [0], [0], [1], [0, 0, 1, 1], [], []>} : vector<8x8xbf16>, vector<8x8xbf16>, vector<8x8xf32> -> vector<8x8xf32>
    %67 = vector.broadcast %64 : vector<8x1xf32> to vector<8x8xf32>
    %68 = arith.mulf %66, %67 : vector<8x8xf32>
    %69 = arith.truncf %68 : vector<8x8xf32> to vector<8x8xbf16>
    %c0_26 = arith.constant 0 : index
    %c8 = arith.constant 8 : index
    %70 = vector.load %arg15[%c0_26, %c8] : memref<8x32xbf16, #tpu.memory_space<vmem>>, vector<8x8xbf16>
    tpu.vector_store %arg15[%c0_26, %c8], %69 {strides = array<i32>} : memref<8x32xbf16, #tpu.memory_space<vmem>>, vector<8x8xbf16>,
    %71 = vector.extract_strided_slice %34 {offsets = [0, 16], sizes = [8, 8], strides = [1, 1]} : vector<8x96xbf16> to vector<8x8xbf16>
    %72 = vector.extract_strided_slice %34 {offsets = [0, 48], sizes = [8, 8], strides = [1, 1]} : vector<8x96xbf16> to vector<8x8xbf16>
    %73 = vector.extract_strided_slice %34 {offsets = [0, 80], sizes = [8, 8], strides = [1, 1]} : vector<8x96xbf16> to vector<8x8xbf16>
    %cst_27 = arith.constant dense<0.000000e+00> : vector<8x8xf32>
    %74 = tpu.matmul %71, %72, %cst_27 {dimension_numbers = #tpu.dot_dimension_numbers<[1], [1], [0], [0], [0, 0, 1, 0], [], []>} : vector<8x8xbf16>, vector<8x8xbf16>, vector<8x8xf32> -> vector<8x8xf32>
    %cst_28 = arith.constant dense<0xFF800000> : vector<8xf32>
    %75 = vector.multi_reduction <maximumf>, %74, %cst_28 [1] : vector<8x8xf32> to vector<8xf32>
    %76 = vector.shape_cast %75 : vector<8xf32> to vector<8x1xf32>
    %77 = vector.broadcast %76 : vector<8x1xf32> to vector<8x8xf32>
    %78 = arith.subf %74, %77 : vector<8x8xf32>
    %79 = math.exp %78 : vector<8x8xf32>
    %cst_29 = arith.constant dense<0.000000e+00> : vector<8xf32>
    %80 = vector.multi_reduction <add>, %79, %cst_29 [1] : vector<8x8xf32> to vector<8xf32>
    %81 = vector.shape_cast %80 : vector<8xf32> to vector<8x1xf32>
    %82 = tpu.reciprocal %81 {approx = true} : vector<8x1xf32> -> vector<8x1xf32>
    %83 = arith.truncf %79 : vector<8x8xf32> to vector<8x8xbf16>
    %cst_30 = arith.constant dense<0.000000e+00> : vector<8x8xf32>
    %84 = tpu.matmul %83, %73, %cst_30 {dimension_numbers = #tpu.dot_dimension_numbers<[1], [0], [0], [1], [0, 0, 1, 1], [], []>} : vector<8x8xbf16>, vector<8x8xbf16>, vector<8x8xf32> -> vector<8x8xf32>
    %85 = vector.broadcast %82 : vector<8x1xf32> to vector<8x8xf32>
    %86 = arith.mulf %84, %85 : vector<8x8xf32>
    %87 = arith.truncf %86 : vector<8x8xf32> to vector<8x8xbf16>
    %c0_31 = arith.constant 0 : index
    %c16 = arith.constant 16 : index
    %88 = vector.load %arg15[%c0_31, %c16] : memref<8x32xbf16, #tpu.memory_space<vmem>>, vector<8x8xbf16>
    tpu.vector_store %arg15[%c0_31, %c16], %87 {strides = array<i32>} : memref<8x32xbf16, #tpu.memory_space<vmem>>, vector<8x8xbf16>,
    %89 = vector.extract_strided_slice %34 {offsets = [0, 24], sizes = [8, 8], strides = [1, 1]} : vector<8x96xbf16> to vector<8x8xbf16>
    %90 = vector.extract_strided_slice %34 {offsets = [0, 56], sizes = [8, 8], strides = [1, 1]} : vector<8x96xbf16> to vector<8x8xbf16>
    %91 = vector.extract_strided_slice %34 {offsets = [0, 88], sizes = [8, 8], strides = [1, 1]} : vector<8x96xbf16> to vector<8x8xbf16>
    %cst_32 = arith.constant dense<0.000000e+00> : vector<8x8xf32>
    %92 = tpu.matmul %89, %90, %cst_32 {dimension_numbers = #tpu.dot_dimension_numbers<[1], [1], [0], [0], [0, 0, 1, 0], [], []>} : vector<8x8xbf16>, vector<8x8xbf16>, vector<8x8xf32> -> vector<8x8xf32>
    %cst_33 = arith.constant dense<0xFF800000> : vector<8xf32>
    %93 = vector.multi_reduction <maximumf>, %92, %cst_33 [1] : vector<8x8xf32> to vector<8xf32>
    %94 = vector.shape_cast %93 : vector<8xf32> to vector<8x1xf32>
    %95 = vector.broadcast %94 : vector<8x1xf32> to vector<8x8xf32>
    %96 = arith.subf %92, %95 : vector<8x8xf32>
    %97 = math.exp %96 : vector<8x8xf32>
    %cst_34 = arith.constant dense<0.000000e+00> : vector<8xf32>
    %98 = vector.multi_reduction <add>, %97, %cst_34 [1] : vector<8x8xf32> to vector<8xf32>
    %99 = vector.shape_cast %98 : vector<8xf32> to vector<8x1xf32>
    %100 = tpu.reciprocal %99 {approx = true} : vector<8x1xf32> -> vector<8x1xf32>
    %101 = arith.truncf %97 : vector<8x8xf32> to vector<8x8xbf16>
    %cst_35 = arith.constant dense<0.000000e+00> : vector<8x8xf32>
    %102 = tpu.matmul %101, %91, %cst_35 {dimension_numbers = #tpu.dot_dimension_numbers<[1], [0], [0], [1], [0, 0, 1, 1], [], []>} : vector<8x8xbf16>, vector<8x8xbf16>, vector<8x8xf32> -> vector<8x8xf32>
    %103 = vector.broadcast %100 : vector<8x1xf32> to vector<8x8xf32>
    %104 = arith.mulf %102, %103 : vector<8x8xf32>
    %105 = arith.truncf %104 : vector<8x8xf32> to vector<8x8xbf16>
    %c0_36 = arith.constant 0 : index
    %c24 = arith.constant 24 : index
    %106 = vector.load %arg15[%c0_36, %c24] : memref<8x32xbf16, #tpu.memory_space<vmem>>, vector<8x8xbf16>
    tpu.vector_store %arg15[%c0_36, %c24], %105 {strides = array<i32>} : memref<8x32xbf16, #tpu.memory_space<vmem>>, vector<8x8xbf16>,
    %c0_37 = arith.constant 0 : index
    %c0_38 = arith.constant 0 : index
    %107 = vector.load %arg15[%c0_37, %c0_38] : memref<8x32xbf16, #tpu.memory_space<vmem>>, vector<8x32xbf16>
    %c0_39 = arith.constant 0 : index
    %c0_40 = arith.constant 0 : index
    %108 = vector.load %arg4[%c0_39, %c0_40] : memref<32x32xbf16, #tpu.memory_space<vmem>>, vector<32x32xbf16>
    %cst_41 = arith.constant dense<0.000000e+00> : vector<8x32xf32>
    %109 = tpu.matmul %107, %108, %cst_41 {dimension_numbers = #tpu.dot_dimension_numbers<[1], [0], [0], [1], [0, 0, 1, 1], [], []>} : vector<8x32xbf16>, vector<32x32xbf16>, vector<8x32xf32> -> vector<8x32xf32>
    %c0_42 = arith.constant 0 : index
    %c0_43 = arith.constant 0 : index
    %110 = vector.load %arg5[%c0_42, %c0_43] : memref<1x32xf32, #tpu.memory_space<vmem>>, vector<1x32xf32>
    %111 = vector.broadcast %110 : vector<1x32xf32> to vector<8x32xf32>
    %112 = arith.addf %109, %111 : vector<8x32xf32>
    %113 = arith.addf %1, %112 : vector<8x32xf32>
    %c0_44 = arith.constant 0 : index
    %c0_45 = arith.constant 0 : index
    %114 = vector.load %arg8[%c0_44, %c0_45] : memref<1x32xf32, #tpu.memory_space<vmem>>, vector<1x32xf32>
    %c0_46 = arith.constant 0 : index
    %c0_47 = arith.constant 0 : index
    %115 = vector.load %arg9[%c0_46, %c0_47] : memref<1x32xf32, #tpu.memory_space<vmem>>, vector<1x32xf32>
    %cst_48 = arith.constant dense<0.000000e+00> : vector<8xf32>
    %116 = vector.multi_reduction <add>, %113, %cst_48 [1] : vector<8x32xf32> to vector<8xf32>
    %117 = vector.shape_cast %116 : vector<8xf32> to vector<8x1xf32>
    %cst_49 = arith.constant 3.200000e+01 : f32
    %118 = vector.broadcast %cst_49 : f32 to vector<8x1xf32>
    %119 = arith.divf %117, %118 : vector<8x1xf32>
    %120 = arith.mulf %113, %113 : vector<8x32xf32>
    %cst_50 = arith.constant dense<0.000000e+00> : vector<8xf32>
    %121 = vector.multi_reduction <add>, %120, %cst_50 [1] : vector<8x32xf32> to vector<8xf32>
    %122 = vector.shape_cast %121 : vector<8xf32> to vector<8x1xf32>
    %cst_51 = arith.constant 3.200000e+01 : f32
    %123 = vector.broadcast %cst_51 : f32 to vector<8x1xf32>
    %124 = arith.divf %122, %123 : vector<8x1xf32>
    %125 = arith.mulf %119, %119 : vector<8x1xf32>
    %126 = arith.subf %124, %125 : vector<8x1xf32>
    %cst_52 = arith.constant 0.000000e+00 : f32
    %127 = vector.broadcast %cst_52 : f32 to vector<8x1xf32>
    %128 = arith.maximumf %126, %127 : vector<8x1xf32>
    %129 = vector.broadcast %119 : vector<8x1xf32> to vector<8x32xf32>
    %130 = arith.subf %113, %129 : vector<8x32xf32>
    %cst_53 = arith.constant 9.99999974E-6 : f32
    %131 = vector.broadcast %cst_53 : f32 to vector<8x1xf32>
    %132 = arith.addf %128, %131 : vector<8x1xf32>
    %133 = math.rsqrt %132 : vector<8x1xf32>
    %134 = vector.broadcast %133 : vector<8x1xf32> to vector<8x32xf32>
    %135 = arith.mulf %130, %134 : vector<8x32xf32>
    %136 = vector.broadcast %114 : vector<1x32xf32> to vector<8x32xf32>
    %137 = arith.mulf %135, %136 : vector<8x32xf32>
    %138 = vector.broadcast %115 : vector<1x32xf32> to vector<8x32xf32>
    %139 = arith.addf %137, %138 : vector<8x32xf32>
    %140 = arith.truncf %139 : vector<8x32xf32> to vector<8x32xbf16>
    %c0_54 = arith.constant 0 : index
    %c0_55 = arith.constant 0 : index
    %141 = vector.load %arg10[%c0_54, %c0_55] : memref<32x128xbf16, #tpu.memory_space<vmem>>, vector<32x128xbf16>
    %cst_56 = arith.constant dense<0.000000e+00> : vector<8x128xf32>
    %142 = tpu.matmul %140, %141, %cst_56 {dimension_numbers = #tpu.dot_dimension_numbers<[1], [0], [0], [1], [0, 0, 1, 1], [], []>} : vector<8x32xbf16>, vector<32x128xbf16>, vector<8x128xf32> -> vector<8x128xf32>
    %c0_57 = arith.constant 0 : index
    %c0_58 = arith.constant 0 : index
    %143 = vector.load %arg11[%c0_57, %c0_58] : memref<1x128xf32, #tpu.memory_space<vmem>>, vector<1x128xf32>
    %144 = vector.broadcast %143 : vector<1x128xf32> to vector<8x128xf32>
    %145 = arith.addf %142, %144 : vector<8x128xf32>
    %cst_59 = arith.constant 1.702000e+00 : f32
    %146 = vector.broadcast %cst_59 : f32 to vector<8x128xf32>
    %147 = arith.mulf %146, %145 : vector<8x128xf32>
    %148 = arith.negf %147 : vector<8x128xf32>
    %149 = math.exp %148 : vector<8x128xf32>
    %cst_60 = arith.constant 1.000000e+00 : f32
    %150 = vector.broadcast %cst_60 : f32 to vector<8x128xf32>
    %151 = arith.addf %150, %149 : vector<8x128xf32>
    %152 = arith.divf %150, %151 : vector<8x128xf32>
    %153 = arith.mulf %145, %152 : vector<8x128xf32>
    %154 = arith.truncf %153 : vector<8x128xf32> to vector<8x128xbf16>
    %c0_61 = arith.constant 0 : index
    %c0_62 = arith.constant 0 : index
    %155 = vector.load %arg12[%c0_61, %c0_62] : memref<128x32xbf16, #tpu.memory_space<vmem>>, vector<128x32xbf16>
    %cst_63 = arith.constant dense<0.000000e+00> : vector<8x32xf32>
    %156 = tpu.matmul %154, %155, %cst_63 {dimension_numbers = #tpu.dot_dimension_numbers<[1], [0], [0], [1], [0, 0, 1, 1], [], []>} : vector<8x128xbf16>, vector<128x32xbf16>, vector<8x32xf32> -> vector<8x32xf32>
    %c0_64 = arith.constant 0 : index
    %c0_65 = arith.constant 0 : index
    %157 = vector.load %arg13[%c0_64, %c0_65] : memref<1x32xf32, #tpu.memory_space<vmem>>, vector<1x32xf32>
    %158 = vector.broadcast %157 : vector<1x32xf32> to vector<8x32xf32>
    %159 = arith.addf %156, %158 : vector<8x32xf32>
    %160 = arith.addf %113, %159 : vector<8x32xf32>
    %c0_66 = arith.constant 0 : index
    %c0_67 = arith.constant 0 : index
    %c0_68 = arith.constant 0 : index
    %161 = vector.load %arg14[%c0_66, %c0_67, %c0_68] : memref<1x8x32xf32, #tpu.memory_space<vmem>>, vector<1x8x32xf32>
    %162 = vector.shape_cast %161 : vector<1x8x32xf32> to vector<8x32xf32>
    %163 = vector.shape_cast %160 : vector<8x32xf32> to vector<1x8x32xf32>
    tpu.vector_store %arg14[%c0_66, %c0_67, %c0_68], %163 {strides = array<i32>} : memref<1x8x32xf32, #tpu.memory_space<vmem>>, vector<1x8x32xf32>,
    return
  }
  func.func @transform_0(%arg0: i32) -> (i32, i32, i32) {
    %c0_i32 = arith.constant 0 : i32
    %c0_i32_0 = arith.constant 0 : i32
    %c0_i32_1 = arith.constant 0 : i32
    return %arg0, %c0_i32, %c0_i32_0 : i32, i32, i32
  }
  func.func @transform_1(%arg0: i32) -> (i32, i32) {
    %c0_i32 = arith.constant 0 : i32
    %c0_i32_0 = arith.constant 0 : i32
    %c0_i32_1 = arith.constant 0 : i32
    return %c0_i32, %c0_i32_0 : i32, i32
  }
  func.func @transform_2(%arg0: i32) -> (i32, i32) {
    %c0_i32 = arith.constant 0 : i32
    %c0_i32_0 = arith.constant 0 : i32
    %c0_i32_1 = arith.constant 0 : i32
    return %c0_i32, %c0_i32_0 : i32, i32
  }
  func.func @transform_3(%arg0: i32) -> (i32, i32) {
    %c0_i32 = arith.constant 0 : i32
    %c0_i32_0 = arith.constant 0 : i32
    %c0_i32_1 = arith.constant 0 : i32
    return %c0_i32, %c0_i32_0 : i32, i32
  }
  func.func @transform_4(%arg0: i32) -> (i32, i32) {
    %c0_i32 = arith.constant 0 : i32
    %c0_i32_0 = arith.constant 0 : i32
    %c0_i32_1 = arith.constant 0 : i32
    return %c0_i32, %c0_i32_0 : i32, i32
  }
  func.func @transform_5(%arg0: i32) -> (i32, i32) {
    %c0_i32 = arith.constant 0 : i32
    %c0_i32_0 = arith.constant 0 : i32
    %c0_i32_1 = arith.constant 0 : i32
    return %c0_i32, %c0_i32_0 : i32, i32
  }
  func.func @transform_6(%arg0: i32) -> (i32, i32) {
    %c0_i32 = arith.constant 0 : i32
    %c0_i32_0 = arith.constant 0 : i32
    %c0_i32_1 = arith.constant 0 : i32
    return %c0_i32, %c0_i32_0 : i32, i32
  }
  func.func @transform_7(%arg0: i32) -> (i32, i32) {
    %c0_i32 = arith.constant 0 : i32
    %c0_i32_0 = arith.constant 0 : i32
    %c0_i32_1 = arith.constant 0 : i32
    return %c0_i32, %c0_i32_0 : i32, i32
  }
  func.func @transform_8(%arg0: i32) -> (i32, i32) {
    %c0_i32 = arith.constant 0 : i32
    %c0_i32_0 = arith.constant 0 : i32
    %c0_i32_1 = arith.constant 0 : i32
    return %c0_i32, %c0_i32_0 : i32, i32
  }
  func.func @transform_9(%arg0: i32) -> (i32, i32) {
    %c0_i32 = arith.constant 0 : i32
    %c0_i32_0 = arith.constant 0 : i32
    %c0_i32_1 = arith.constant 0 : i32
    return %c0_i32, %c0_i32_0 : i32, i32
  }
  func.func @transform_10(%arg0: i32) -> (i32, i32) {
    %c0_i32 = arith.constant 0 : i32
    %c0_i32_0 = arith.constant 0 : i32
    %c0_i32_1 = arith.constant 0 : i32
    return %c0_i32, %c0_i32_0 : i32, i32
  }
  func.func @transform_11(%arg0: i32) -> (i32, i32) {
    %c0_i32 = arith.constant 0 : i32
    %c0_i32_0 = arith.constant 0 : i32
    %c0_i32_1 = arith.constant 0 : i32
    return %c0_i32, %c0_i32_0 : i32, i32
  }
  func.func @transform_12(%arg0: i32) -> (i32, i32) {
    %c0_i32 = arith.constant 0 : i32
    %c0_i32_0 = arith.constant 0 : i32
    %c0_i32_1 = arith.constant 0 : i32
    return %c0_i32, %c0_i32_0 : i32, i32
  }
  func.func @transform_13(%arg0: i32) -> (i32, i32, i32) {
    %c0_i32 = arith.constant 0 : i32
    %c0_i32_0 = arith.constant 0 : i32
    %c0_i32_1 = arith.constant 0 : i32
    return %arg0, %c0_i32, %c0_i32_0 : i32, i32, i32
  }
}

</mosaic_0001>

<bundles_post_ra>
// kernel: tpu_custom_call.1
= control target key start
LH: loop header
LB: loop body
LE: loop exit
PB: predicated region body
PF: predicated region fallthrough
CT: control target
= control target key end

     0   :  { %s2062_s0 = inlined_call_operand.vmem [shape: f32[2,8,32], index: 0, kind: input, shape index: {}]   ;;  %s2063_s1 = inlined_call_operand.vmem [shape: bf16[32,96], index: 1, kind: input, shape index: {}]   ;;  %s2064_s2 = inlined_call_operand.vmem [shape: f32[1,96], index: 2, kind: input, shape index: {}]   ;;  %s2065_s3 = inlined_call_operand.vmem [shape: bf16[32,32], index: 3, kind: input, shape index: {}]   ;;  %s2066_s4 = inlined_call_operand.vmem [shape: f32[1,32], index: 4, kind: input, shape index: {}]   ;;  %s2067_s5 = inlined_call_operand.vmem [shape: f32[1,32], index: 5, kind: input, shape index: {}]   ;;  %s2068_s6 = inlined_call_operand.vmem [shape: f32[1,32], index: 6, kind: input, shape index: {}]   ;;  %s2069_s7 = inlined_call_operand.vmem [shape: f32[1,32], index: 7, kind: input, shape index: {}]   ;;  %s2070_s8 = inlined_call_operand.vmem [shape: f32[1,32], index: 8, kind: input, shape index: {}]   ;;  %s2071_s9 = inlined_call_operand.vmem [shape: bf16[32,128], index: 9, kind: input, shape index: {}]   ;;  %s2072_s10 = inlined_call_operand.vmem [shape: f32[1,128], index: 10, kind: input, shape index: {}]   ;;  %s2073_s11 = inlined_call_operand.vmem [shape: bf16[128,32], index: 11, kind: input, shape index: {}]   ;;  %s2074_s12 = inlined_call_operand.vmem [shape: f32[1,32], index: 12, kind: input, shape index: {}]   ;;  %s2075_s13 = inlined_call_operand.hbm [shape: f32[2,8,32], index: 13, kind: output, shape index: {}]  }
   0x1   :  { %2076 = sst [smem:[#allocation6_spill]] %s2062_s0 }
   0x2   :  { %2077 = sst [smem:[#allocation7_spill]] %s2063_s1 }
   0x3   :  { %2078 = sst [smem:[#allocation8_spill]] %s2064_s2 }
   0x4   :  { %18 = vsyncpa [#allocation4], 0 }
   0x5   :  { %20 = vsyncpa [#allocation4 + $0x1], 0  ;;  %s1791_s25 = smov 0   ;;  %s1793_s26 = smov 0  }
   0x6   :  { %s1795_s27 = smov 0   ;;  %s1797_s28 = smov 0  }
   0x7 LB: > { %s1812_s29 = sadd.s32 4294967295, %s1702_s28   ;;  %s1373_s30 = sadd.s32 4294967294, %s1702_s28   ;;  %s1702_s28 = sphi %s1797_s28, %s2087_s28   ;;  %s1698_s27 = sphi %s1795_s27, %s2086_s27   ;;  %s1694_s26 = sphi %s1793_s26, %s2085_s26   ;;  %s1690_s25 = sphi %s1791_s25, %s2084_s25  }
   0x8   : > { %s1816_s14 = sadd.s32 1, %s1702_s28   ;;  %s311_s15 = sadd.s32 1, %s1698_s27 }
   0x9   : > { %s308_s16 = ssub.s32 %s1702_s28, %s1816_s14  ;;  %p321_p0 = scmp.ne.s32.totalorder %s1698_s27, %s1694_s26 }
   0xa   : > { %p309_p1 = scmp.eq.s32.totalorder %s308_s16, 0  ;;  %p322_p2 = scmp.eq.s32.totalorder %s1812_s29, 1 }
   0xb   : > { %p327_p3 = scmp.ne.s32.totalorder %s1694_s26, %s1690_s25  ;;  %p328_p4 = scmp.eq.s32.totalorder %s1373_s30, 1 }
   0xc   : > { %s1827_s17 = scalar_select %p309_p1, %s1698_s27, %s311_s15  }
   0xd   : > { %p1829_p5 = por %p322_p2, %p321_p0  ;;  %p1833_p6 = por %p328_p4, %p327_p3 }
   0xe   : > { %p1376_p7 = scmp.ge.s32.totalorder %s1702_s28, 1  ;;  %p389_p8 = scmp.lt.s32.totalorder %s1702_s28, 3 }
  0x10   : > { %p390_p9 = pnand %p1376_p7, %p389_p8 }
  0x11   : > { %p432_p10 = scmp.lt.s32.totalorder (!%p390_p9), %s1812_s29, 1  ;;  %s2081_s0 = sld [smem:[#allocation6_spill]] (!%p390_p9) }
  0x12   : > { %393 = sbr.rel (%p390_p9) target bundleno = 2066 (0x812), region = 72  ;;  %s2082_s1 = sld [smem:[#allocation7_spill]] (!%p390_p9) }
  0x13   : > { %s2083_s2 = sld [smem:[#allocation8_spill]] (!%p390_p9)  ;;  %s1706_s16 = smov (!%p390_p9), 120  }
  0x14   : > { %s1709_s22 = smov (!%p390_p9), 80   ;;  %s1710_s23 = smov (!%p390_p9), 112  }
  0x15   : > { %s1712_s30 = smov (!%p390_p9), 104   ;;  %s1713_s15 = smov (!%p390_p9), 64  }
  0x17   : > { %s433_s20 = scalar_select %p432_p10, %s1812_s29, 1  ;;  %vm440_vm0 = vcmask 261120   ;;  %v1704_v5 = vmov 0.0   ;;  %vm1705_vm1 = vmmov 0   ;;  %v1379_v17 = vld [vmem:[%s2067_s5] ss:$0 sm:$0xff] }
  0x18   : > { %v1604_v4 = vld [vmem:[%s2082_s1 + $0x8] sm:$0xff]   ;;  %1457 = vmatprep.subr.bf16.mxu0 %v1704_v5  ;;  %1461 = vmatprep.mubr.msk.bf16.mxu0 %vm1705_vm1, %v1704_v5  ;;  %v1605_v6 = vld [vmem:[%s2082_s1] sm:$0xff]   ;;  %vm543_vm2 = vcmask 64512   ;;  %vm606_vm3 = vcmask 1043456   ;;  %vm652_vm4 = vcmask 60416   ;;  %vm771_vm5 = vcmask 126016  }
  0x19   : > { %s1378_s21 = sshll.u32 %s433_s20, 3  ;;  %1458 = vmatpush3.bf16.msra.mxu0 %v1604_v4  ;;  %1477 = vmatprep.subr.bf16.mxu1 %v1704_v5  ;;  %v1380_v19 = vld [vmem:[%s2068_s6] ss:$0 sm:$0xff]  ;;  %s1707_s20 = smov 96   ;;  %vm890_vm6 = vcmask 191616   ;;  %vm1009_vm7 = vcmask 257216  }
  0x1a   : > { %s435_s24 = scalar_lea.vmem %s2081_s0, %s1378_s21  ;;  %1459 = vmatprep.subr.bf16.mxu0 %v1704_v5  ;;  %1479 = vmatprep.mubr.msk.bf16.mxu1 %vm1705_vm1, %v1704_v5  ;;  %v1381_v23 = vld [vmem:[%s2083_s2] ss:$0 sm:$0xff]  ;;  %s1708_s21 = smov 88  }
  0x1b   : > { %v1844_v0 = vld [vmem:[%s435_s24] sm:$0xff]  ;;  %s1711_s24 = smov 72  }
  0x1c   : > { %v441_v1 = vsel %vm440_vm0, %v1844_v0, 0.0  ;;  %v446_v2 = vmul.f32 %v1844_v0, %v1844_v0 }
  0x1d   : > { %442 = vadd.xlane.f32.xlu0 %v441_v1  ;;  %1460 = vmatpush3.bf16.msra.mxu0 %v1605_v6 }
  0x1e   : > { %v447_v3 = vsel %vm440_vm0, %v446_v2, 0.0  ;;  %1465 = vmatprep.subr.bf16.mxu0 %v1704_v5 }
  0x21   : > { %448 = vadd.xlane.f32.xlu0 %v447_v3 }
  0xa6   : > { %v443_v7 = vpop.xlane.xlu0 %442 }
  0xa7   : > { %v445_v8 = vmul.f32 0.03125, %v443_v7 }
  0xa9   : > { %v451_v10 = vmul.f32 %v445_v8, %v445_v8  ;;  %v454_v15 = vsub.f32 %v1844_v0, %v445_v8 }
  0xaa   : > { %v449_v9 = vpop.xlane.xlu0 %448 }
  0xab   : > { %v450_v11 = vmul.f32 0.03125, %v449_v9 }
  0xad   : > { %v452_v12 = vsub.f32 %v450_v11, %v451_v10 }
  0xaf   : > { %v453_v13 = vmax.f32 %v452_v12, 0.0 }
  0xb1   : > { %v455_v14 = vadd.f32 1e-05, %v453_v13 }
  0xb3   : > { %1618 = vrsqrt.f32 %v455_v14 }
  0xc0   : > { %v1619_v16 = vpop.eup %1618 }
  0xc1   : > { %v457_v18 = vmul.f32 %v1619_v16, %v454_v15 }
  0xc3   : > { %v464_v20 = vmul.f32 %v1379_v17, %v457_v18 }
  0xc5   : > { %v471_v21 = vadd.f32 %v1380_v19, %v464_v20 }
  0xc7   : > { %v472_v22 = vpack.c.bf16 %v471_v21, %v471_v21 }
  0xc9   : > { %1462 = vmatmul.mubr.msk.bf16.vlgmr.msra.gmra.mxu0 %vm440_vm0, %v472_v22 }
  0xca   : > { %1467 = vmatprep.mubr.msk.bf16.mxu0 %vm1705_vm1, %v1704_v5 }
 0x189   : > { %v533_v24 = vpop.f32.mrf.mxu0 }
 0x18a   : > { %v534_v25 = vadd.f32 %v1381_v23, %v533_v24 }
 0x18b   : > { %v1463_v26 = vpop.f32.mrf.mxu0 }
 0x18c   : > { %v1878_v27 = vpack.c.bf16 %v534_v25, %v534_v25 }
 0x18d   : > { %v536_v28 = vpop.f32.mrf.mxu0 }
 0x18e   : > { %654 = vrot.lane.b32.xlu0 %v1878_v27, %s1706_s16  ;;  %541 = vrot.lane.b32.xlu1 %v1878_v27, %s1707_s20  ;;  %s1714_s16 = smov 56   ;;  %s1715_s20 = smov 48  }
 0x18f   : > { %v1464_v29 = vpop.f32.mrf.mxu0 }
 0x192   : > { %656 = vrot.lane.b32.xlu1 %v1878_v27, %s1708_s21  ;;  %s1716_s21 = smov 40  }
 0x196   : > { %775 = vrot.lane.b32.xlu1 %v1878_v27, %s1709_s22  ;;  %s1717_s22 = smov 8  }
 0x19a   : > { %773 = vrot.lane.b32.xlu1 %v1878_v27, %s1710_s23 }
 0x19e   : > { %894 = vrot.lane.b32.xlu1 %v1878_v27, %s1711_s24 }
 0x1a2   : > { %892 = vrot.lane.b32.xlu1 %v1878_v27, %s1712_s30  ;;  %s429_s30 = sand.u32 1, %s1694_s26  }
 0x200   : > { %v542_v30 = vpop.permute.xlu1 %541  ;;  %v655_v35 = vpop.permute.xlu0 %654 }
 0x201   : > { %v548_v31 = vsel %vm543_vm2, %v542_v30, 0 }
 0x202   : > { %1466 = vmatpush3.bf16.xpose.msra.mxu0 %v548_v31 }
 0x203   : > { %1471 = vmatprep.subr.bf16.mxu0 %v1704_v5 }
 0x204   : > { %v657_v32 = vpop.permute.xlu1 %656 }
 0x205   : > { %v662_v33 = vsel %vm543_vm2, %v657_v32, 0 }
 0x206   : > { %1478 = vmatpush3.bf16.xpose.msra.mxu1 %v662_v33 }
 0x207   : > { %1489 = vmatprep.subr.bf16.mxu1 %v1704_v5 }
 0x208   : > { %v776_v34 = vpop.permute.xlu1 %775 }
 0x209   : > { %1468 = vmatmul.mubr.msk.bf16.vlgmr.msra.gmra.mxu0 %vm543_vm2, %v1878_v27  ;;  %v781_v37 = vsel %vm543_vm2, %v776_v34, 0 }
 0x20a   : > { %1473 = vmatprep.mubr.msk.bf16.mxu0 %vm1705_vm1, %v1704_v5 }
 0x20c   : > { %v774_v36 = vpop.permute.xlu1 %773 }
 0x20d   : > { %1480 = vmatmul.mubr.msk.bf16.vlgmr.msra.gmra.mxu1 %vm543_vm2, %v655_v35 }
 0x20e   : > { %1490 = vmatpush3.bf16.xpose.msra.mxu1 %v781_v37  ;;  %1491 = vmatprep.mubr.msk.bf16.mxu1 %vm1705_vm1, %v1704_v5 }
 0x20f   : > { %1501 = vmatprep.subr.bf16.mxu1 %v1704_v5 }
 0x210   : > { %v895_v38 = vpop.permute.xlu1 %894 }
 0x211   : > { %v900_v39 = vsel %vm543_vm2, %v895_v38, 0 }
 0x214   : > { %v893_v40 = vpop.permute.xlu1 %892 }
 0x215   : > { %1492 = vmatmul.mubr.msk.bf16.vlgmr.msra.gmra.mxu1 %vm543_vm2, %v774_v36 }
 0x216   : > { %1502 = vmatpush3.bf16.xpose.msra.mxu1 %v900_v39  ;;  %1503 = vmatprep.mubr.msk.bf16.mxu1 %vm1705_vm1, %v1704_v5 }
 0x217   : > { %1513 = vmatprep.subr.bf16.mxu1 %v1704_v5 }
 0x21d   : > { %1504 = vmatmul.mubr.msk.bf16.vlgmr.msra.gmra.mxu1 %vm543_vm2, %v893_v40 }
 0x21e   : > { %1517 = vmatprep.mubr.msk.bf16.mxu1 %vm1705_vm1, %v1704_v5 }
 0x2c9   : > { %v584_v41 = vpop.f32.mrf.mxu0 }
 0x2ca   : > { %v590_v42 = vsel %vm543_vm2, %v584_v41, -inf }
 0x2cb   : > { %591 = vmax.xlane.f32.xlu1 %v590_v42  ;;  %v1469_v43 = vpop.f32.mrf.mxu0 }
 0x2cd   : > { %v587_v44 = vpop.f32.mrf.mxu0  ;;  %v698_v45 = vpop.f32.mrf.mxu1 }
 0x2ce   : > { %v704_v46 = vsel %vm543_vm2, %v698_v45, -inf }
 0x2cf   : > { %705 = vmax.xlane.f32.xlu0 %v704_v46  ;;  %v1470_v47 = vpop.f32.mrf.mxu0  ;;  %v1481_v48 = vpop.f32.mrf.mxu1 }
 0x2d1   : > { %v701_v49 = vpop.f32.mrf.mxu1 }
 0x2d3   : > { %v1482_v50 = vpop.f32.mrf.mxu1 }
 0x2d5   : > { %v817_v51 = vpop.f32.mrf.mxu1 }
 0x2d6   : > { %v823_v60 = vsel %vm543_vm2, %v817_v51, -inf }
 0x2d7   : > { %v1493_v52 = vpop.f32.mrf.mxu1 }
 0x2d9   : > { %v820_v53 = vpop.f32.mrf.mxu1 }
 0x2db   : > { %v1494_v54 = vpop.f32.mrf.mxu1 }
 0x2dc   : > { %601 = vrot.lane.b32.xlu1 %v1878_v27, %s1713_s15  ;;  %v1607_v54 = vld [vmem:[%s2065_s3] sm:$0xff]   ;;  %s1377_s15 = sshll.u32 %s429_s30, 3 }
 0x2dd   : > { %v936_v55 = vpop.f32.mrf.mxu1 }
 0x2de   : > { %v942_v56 = vsel %vm543_vm2, %v936_v55, -inf }
 0x2df   : > { %943 = vmax.xlane.f32.xlu0 %v942_v56  ;;  %v1505_v57 = vpop.f32.mrf.mxu1 }
 0x2e1   : > { %v939_v58 = vpop.f32.mrf.mxu1 }
 0x2e3   : > { %v1506_v59 = vpop.f32.mrf.mxu1 }
 0x2f5   : > { %715 = vrot.lane.b32.xlu0 %v1878_v27, %s1714_s16  ;;  %s1718_s16 = smov 16  }
 0x300   : > { %824 = vmax.xlane.f32.xlu1 %v823_v60 }
 0x311   : > { %834 = vrot.lane.b32.xlu1 %v1878_v27, %s1715_s20  ;;  %s1719_s20 = smov 24  }
 0x315   : > { %953 = vrot.lane.b32.xlu1 %v1878_v27, %s1716_s21  ;;  %s1417_s21 = sshll.u32 %s1812_s29, 7  ;;  %s1301_s29 = scalar_lea.sflag [#allocation4], %s429_s30 }
 0x316   : > { %s2020_s1 = scalar_lea.hbm %s2075_s13, %s1417_s21 }
 0x354   : > { %v592_v61 = vpop.xlane.xlu1 %591 }
 0x355   : > { %v593_v62 = vsub.f32 %v584_v41, %v592_v61 }
 0x357   : > { %v594_v63 = vmul.f32 1.442695, %v593_v62 }
 0x358   : > { %v706_v1 = vpop.xlane.xlu0 %705  ;;  %v602_v2 = vpop.permute.xlu1 %601 }
 0x359   : > { %1620 = vpow2.f32 %v594_v63  ;;  %v707_v3 = vsub.f32 %v698_v45, %v706_v1  ;;  %v608_v4 = vsel %vm606_vm3, %v602_v2, 0 }
 0x35a   : > { %1472 = vmatpush3.bf16.msra.mxu0 %v608_v4 }
 0x35b   : > { %v708_v6 = vmul.f32 1.442695, %v707_v3  ;;  %1483 = vmatprep.subr.bf16.mxu0 %v1704_v5 }
 0x35d   : > { %1622 = vpow2.f32 %v708_v6 }
 0x366   : > { %v1621_v7 = vpop.eup %1620 }
 0x367   : > { %v600_v8 = vpack.c.bf16 %v1621_v7, %v1621_v7  ;;  %v596_v19 = vsel %vm543_vm2, %v1621_v7, 0.0  ;;  %v1396_v7 = vld [vmem:[%s2066_s4] ss:$0 sm:$0xff] }
 0x368   : > { %v944_v9 = vpop.xlane.xlu0 %943 }
 0x369   : > { %v945_v10 = vsub.f32 %v936_v55, %v944_v9  ;;  %1474 = vmatmul.mubr.msk.bf16.vlgmr.msra.gmra.mxu0 %vm543_vm2, %v600_v8 }
 0x36a   : > { %v1623_v11 = vpop.eup %1622  ;;  %1485 = vmatprep.mubr.msk.bf16.mxu0 %vm1705_vm1, %v1704_v5 }
 0x36b   : > { %v946_v12 = vmul.f32 1.442695, %v945_v10  ;;  %v710_v13 = vsel %vm543_vm2, %v1623_v11, 0.0  ;;  %v714_v16 = vpack.c.bf16 %v1623_v11, %v1623_v11 }
 0x36c   : > { %711 = vadd.xlane.f32.xlu0 %v710_v13  ;;  %v716_v14 = vpop.permute.xlu0 %715 }
 0x36d   : > { %1624 = vpow2.f32 %v946_v12  ;;  %v721_v15 = vsel %vm606_vm3, %v716_v14, 0 }
 0x36e   : > { %1484 = vmatpush3.bf16.msra.mxu0 %v721_v15 }
 0x36f   : > { %1495 = vmatprep.subr.bf16.mxu0 %v1704_v5 }
 0x371   : > { %1486 = vmatmul.mubr.msk.bf16.vlgmr.msra.gmra.mxu0 %vm543_vm2, %v714_v16 }
 0x372   : > { %1497 = vmatprep.mubr.msk.bf16.mxu0 %vm1705_vm1, %v1704_v5 }
 0x37a   : > { %v1625_v17 = vpop.eup %1624 }
 0x37b   : > { %v948_v18 = vsel %vm543_vm2, %v1625_v17, 0.0  ;;  %v952_v30 = vpack.c.bf16 %v1625_v17, %v1625_v17  ;;  %v1608_v17 = vld [vmem:[%s2071_s9 + $0x8] sm:$0xff]  }
 0x37c   : > { %949 = vadd.xlane.f32.xlu0 %v948_v18 }
 0x380   : > { %597 = vadd.xlane.f32.xlu0 %v596_v19 }
 0x389   : > { %v825_v20 = vpop.xlane.xlu1 %824 }
 0x38a   : > { %v826_v21 = vsub.f32 %v817_v51, %v825_v20  ;;  %v1606_v51 = vld [vmem:[%s2065_s3 + $0x8] sm:$0xff]  }
 0x38b   : > { %1514 = vmatpush3.bf16.msra.mxu1 %v1606_v51 }
 0x38c   : > { %v827_v22 = vmul.f32 1.442695, %v826_v21  ;;  %1515 = vmatprep.subr.bf16.mxu1 %v1704_v5 }
 0x38d   : > { %v835_v23 = vpop.permute.xlu1 %834 }
 0x38e   : > { %1626 = vpow2.f32 %v827_v22  ;;  %v840_v24 = vsel %vm606_vm3, %v835_v23, 0 }
 0x38f   : > { %1496 = vmatpush3.bf16.msra.mxu0 %v840_v24  ;;  %1516 = vmatpush3.bf16.msra.mxu1 %v1607_v54  ;;  %v1407_v54 = vld [vmem:[%s2074_s12] ss:$0 sm:$0xff] }
 0x390   : > { %1507 = vmatprep.subr.bf16.mxu0 %v1704_v5  ;;  %1529 = vmatprep.subr.bf16.mxu1 %v1704_v5 }
 0x391   : > { %v954_v26 = vpop.permute.xlu1 %953 }
 0x392   : > { %v959_v29 = vsel %vm606_vm3, %v954_v26, 0 }
 0x39b   : > { %v1627_v25 = vpop.eup %1626 }
 0x39c   : > { %v829_v27 = vsel %vm543_vm2, %v1627_v25, 0.0  ;;  %v833_v28 = vpack.c.bf16 %v1627_v25, %v1627_v25 }
 0x39d   : > { %830 = vadd.xlane.f32.xlu1 %v829_v27 }
 0x39e   : > { %1498 = vmatmul.mubr.msk.bf16.vlgmr.msra.gmra.mxu0 %vm543_vm2, %v833_v28  ;;  %v1400_v28 = vld [vmem:[%s2069_s7] ss:$0 sm:$0xff] }
 0x39f   : > { %1508 = vmatpush3.bf16.msra.mxu0 %v959_v29  ;;  %1509 = vmatprep.mubr.msk.bf16.mxu0 %vm1705_vm1, %v1704_v5 }
 0x3a0   : > { %1521 = vmatprep.subr.bf16.mxu0 %v1704_v5 }
 0x3a6   : > { %1510 = vmatmul.mubr.msk.bf16.vlgmr.msra.gmra.mxu0 %vm543_vm2, %v952_v30  ;;  %v1401_v30 = vld [vmem:[%s2070_s8] ss:$0 sm:$0xff] }
 0x3a7   : > { %1525 = vmatprep.mubr.msk.bf16.mxu0 %vm1705_vm1, %v1704_v5  ;;  %1522 = vmatpush3.bf16.msra.mxu0 %v1608_v17 }
 0x3a8   : > { %1523 = vmatprep.subr.bf16.mxu0 %v1704_v5 }
 0x3f5   : > { %v712_v31 = vpop.xlane.xlu0 %711 }
 0x405   : > { %v950_v32 = vpop.xlane.xlu0 %949 }
 0x409   : > { %v598_v33 = vpop.xlane.xlu0 %597 }
 0x40a   : > { %1628 = vrcp.f32 %v598_v33 }
 0x40b   : > { %1630 = vrcp.f32 %v712_v31 }
 0x417   : > { %v1629_v34 = vpop.eup %1628 }
 0x418   : > { %v1631_v41 = vpop.eup %1630 }
 0x426   : > { %v831_v48 = vpop.xlane.xlu1 %830 }
 0x427   : > { %1632 = vrcp.f32 %v831_v48 }
 0x428   : > { %1634 = vrcp.f32 %v950_v32 }
 0x429   : > { %v644_v35 = vpop.f32.mrf.mxu0 }
 0x42a   : > { %v650_v36 = vmul.f32 %v1629_v34, %v644_v35  ;;  %v1610_v34 = vld [vmem:[%s2073_s11 + $0x38] sm:$0xff]   ;;  %v1611_v35 = vld [vmem:[%s2073_s11 + $0x30] sm:$0xff]  }
 0x42b   : > { %v1475_v37 = vpop.f32.mrf.mxu0 }
 0x42c   : > { %v651_v38 = vpack.c.bf16 %v650_v36, %v650_v36  ;;  %v1612_v36 = vld [vmem:[%s2073_s11 + $0x28] sm:$0xff]   ;;  %v1613_v37 = vld [vmem:[%s2073_s11 + $0x20] sm:$0xff]  }
 0x42d   : > { %v647_v39 = vpop.f32.mrf.mxu0 }
 0x42e   : > { %653 = vst.msk [vmem:[#allocation2] sm:$0xf] %vm652_vm4, %v651_v38  ;;  %v1614_v38 = vld [vmem:[%s2073_s11 + $0x18] sm:$0xff]   ;;  %v1615_v39 = vld [vmem:[%s2073_s11 + $0x10] sm:$0xff]  }
 0x42f   : > { %v1476_v40 = vpop.f32.mrf.mxu0 }
 0x430   : > { %v1616_v40 = vld [vmem:[%s2073_s11 + $0x8] sm:$0xff]  }
 0x431   : > { %v757_v42 = vpop.f32.mrf.mxu0 }
 0x432   : > { %v763_v43 = vmul.f32 %v1631_v41, %v757_v42  ;;  %v1617_v41 = vld [vmem:[%s2073_s11] sm:$0xff]  }
 0x433   : > { %v1487_v44 = vpop.f32.mrf.mxu0  ;;  %v1402_v42 = vld [vmem:[%s2072_s10] ss:$0 sm:$0xff] }
 0x434   : > { %v1420_v45 = vpack.c.bf16 %v763_v43, %v763_v43  ;;  %v1633_v49 = vpop.eup %1632 }
 0x435   : > { %v760_v46 = vpop.f32.mrf.mxu0  ;;  %v1635_v58 = vpop.eup %1634 }
 0x436   : > { %768 = vrot.lane.b32.xlu1 %v1420_v45, %s1717_s22  ;;  %s431_s22 = scalar_lea.vmem [#allocation3], %s1377_s15 }
 0x437   : > { %v1488_v47 = vpop.f32.mrf.mxu0  ;;  %s1314_s23 = sshll.u32 %s431_s22, 4  ;;  %s2022_s23 = int_to_ptr.vmem [resolvable:$true] %s1314_s23 }
 0x438   : > { %s1642_s15 = scalar_lea.vmem %s2022_s23, 128 }
 0x439   : > { %p1643_p11 = scmp.ne.s32.totalorder %s2022_s23, %s1642_s15 }
 0x43b   : > { %p1644_p12 = pnand %p1643_p11, %p1829_p5 }
 0x43d   : > { %p1645_p13 = pneg %p1644_p12 }
 0x45e   : > { %v876_v50 = vpop.f32.mrf.mxu0 }
 0x45f   : > { %v882_v52 = vmul.f32 %v1633_v49, %v876_v50 }
 0x460   : > { %v1499_v53 = vpop.f32.mrf.mxu0 }
 0x461   : > { %v1421_v55 = vpack.c.bf16 %v882_v52, %v882_v52 }
 0x462   : > { %v879_v56 = vpop.f32.mrf.mxu0 }
 0x463   : > { %887 = vrot.lane.b32.xlu0 %v1421_v55, %s1718_s16  ;;  %s1720_s16 = smov [#allocation3]  }
 0x464   : > { %v1500_v57 = vpop.f32.mrf.mxu0 }
 0x466   : > { %v995_v59 = vpop.f32.mrf.mxu0 }
 0x467   : > { %v1001_v60 = vmul.f32 %v1635_v58, %v995_v59 }
 0x468   : > { %v1511_v61 = vpop.f32.mrf.mxu0 }
 0x469   : > { %v1422_v62 = vpack.c.bf16 %v1001_v60, %v1001_v60 }
 0x46a   : > { %v998_v63 = vpop.f32.mrf.mxu0 }
 0x46b   : > { %1006 = vrot.lane.b32.xlu1 %v1422_v62, %s1719_s20  ;;  %s1646_s20 = sshll.u32 %s1720_s16, 4  ;;  %s1647_s20 = int_to_ptr.vmem [resolvable:$false] %s1646_s20 }
 0x46c   : > { %v1512_v1 = vpop.f32.mrf.mxu0  ;;  %s1648_s0 = scalar_lea.vmem %s1647_s20, 256  ;;  %p1649_p0 = scmp.lt.s32.totalorder %s2022_s23, %s1647_s20 }
 0x46d   : > { %p1650_p1 = scmp.lt.s32.totalorder %s1648_s0, %s1642_s15 }
 0x46f   : > { %p1651_p2 = por %p1650_p1, %p1649_p0 }
 0x471   : > { %p1652_p3 = pnand %p1651_p2, %p1645_p13 }
 0x4a8   : > { %v769_v2 = vpop.permute.xlu1 %768 }
 0x4a9   : > { %772 = vst.msk [vmem:[#allocation2] sm:$0xf] %vm771_vm5, %v769_v2 }
 0x4d5   : > { %v888_v3 = vpop.permute.xlu0 %887 }
 0x4d6   : > { %891 = vst.msk [vmem:[#allocation2] sm:$0xf] %vm890_vm6, %v888_v3 }
 0x4dd   : > { %v1007_v4 = vpop.permute.xlu1 %1006 }
 0x4de   : > { %1010 = vst.msk [vmem:[#allocation2] sm:$0xf] %vm1009_vm7, %v1007_v4 }
 0x4e5   : > { %v1011_v6 = vld [vmem:[#allocation2] sm:$0xf] }
 0x4e6   : > { %1518 = vmatmul.mubr.msk.bf16.vlgmr.msra.gmra.mxu1 %vm440_vm0, %v1011_v6 }
 0x4e7   : > { %1545 = vmatprep.mubr.msk.bf16.mxu1 %vm1705_vm1, %v1704_v5  ;;  %1530 = vmatpush3.bf16.msra.mxu1 %v1610_v34 }
 0x4e8   : > { %1531 = vmatprep.subr.bf16.mxu1 %v1704_v5 }
 0x4eb   : > { %1532 = vmatpush3.bf16.msra.mxu1 %v1611_v35 }
 0x4ec   : > { %1533 = vmatprep.subr.bf16.mxu1 %v1704_v5 }
 0x4ef   : > { %1534 = vmatpush3.bf16.msra.mxu1 %v1612_v36 }
 0x4f0   : > { %1535 = vmatprep.subr.bf16.mxu1 %v1704_v5 }
 0x4f3   : > { %1536 = vmatpush3.bf16.msra.mxu1 %v1613_v37 }
 0x4f4   : > { %1537 = vmatprep.subr.bf16.mxu1 %v1704_v5 }
 0x4f7   : > { %1538 = vmatpush3.bf16.msra.mxu1 %v1614_v38 }
 0x4f8   : > { %1539 = vmatprep.subr.bf16.mxu1 %v1704_v5 }
 0x4fb   : > { %1540 = vmatpush3.bf16.msra.mxu1 %v1615_v39 }
 0x4fc   : > { %1541 = vmatprep.subr.bf16.mxu1 %v1704_v5 }
 0x4ff   : > { %1542 = vmatpush3.bf16.msra.mxu1 %v1616_v40 }
 0x500   : > { %1543 = vmatprep.subr.bf16.mxu1 %v1704_v5 }
 0x503   : > { %1544 = vmatpush3.bf16.msra.mxu1 %v1617_v41 }
 0x5a6   : > { %v1072_v8 = vpop.f32.mrf.mxu1 }
 0x5a7   : > { %v1073_v9 = vadd.f32 %v1396_v7, %v1072_v8 }
 0x5a8   : > { %v1519_v10 = vpop.f32.mrf.mxu1 }
 0x5a9   : > { %v1955_v11 = vadd.f32 %v1073_v9, %v1844_v0  ;;  %v1609_v0 = vld [vmem:[%s2071_s9] sm:$0xff]  }
 0x5aa   : > { %v1075_v12 = vpop.f32.mrf.mxu1  ;;  %1524 = vmatpush3.bf16.msra.mxu0 %v1609_v0 }
 0x5ab   : > { %v1081_v13 = vsel %vm440_vm0, %v1955_v11, 0.0  ;;  %v1085_v14 = vmul.f32 %v1955_v11, %v1955_v11 }
 0x5ac   : > { %1082 = vadd.xlane.f32.xlu1 %v1081_v13  ;;  %v1520_v15 = vpop.f32.mrf.mxu1 }
 0x5ad   : > { %v1086_v16 = vsel %vm440_vm0, %v1085_v14, 0.0 }
 0x5ae   : > { %1087 = vadd.xlane.f32.xlu0 %v1086_v16 }
 0x635   : > { %v1083_v18 = vpop.xlane.xlu1 %1082 }
 0x636   : > { %v1084_v19 = vmul.f32 0.03125, %v1083_v18 }
 0x637   : > { %v1088_v20 = vpop.xlane.xlu0 %1087 }
 0x638   : > { %v1090_v21 = vmul.f32 %v1084_v19, %v1084_v19  ;;  %v1089_v22 = vmul.f32 0.03125, %v1088_v20  ;;  %v1093_v26 = vsub.f32 %v1955_v11, %v1084_v19 }
 0x63a   : > { %v1091_v23 = vsub.f32 %v1089_v22, %v1090_v21 }
 0x63c   : > { %v1092_v24 = vmax.f32 %v1091_v23, 0.0 }
 0x63e   : > { %v1094_v25 = vadd.f32 1e-05, %v1092_v24 }
 0x640   : > { %1636 = vrsqrt.f32 %v1094_v25 }
 0x64d   : > { %v1637_v27 = vpop.eup %1636 }
 0x64e   : > { %v1096_v29 = vmul.f32 %v1637_v27, %v1093_v26 }
 0x650   : > { %v1103_v31 = vmul.f32 %v1400_v28, %v1096_v29 }
 0x652   : > { %v1110_v32 = vadd.f32 %v1401_v30, %v1103_v31 }
 0x654   : > { %v1111_v33 = vpack.c.bf16 %v1110_v32, %v1110_v32 }
 0x656   : > { %1526 = vmatmul.mubr.msk.bf16.vlgmr.msra.gmra.mxu0 %vm440_vm0, %v1111_v33 }
 0x716   : > { %v1172_v43 = vpop.f32.mrf.mxu0 }
 0x717   : > { %v1173_v44 = vadd.f32 %v1402_v42, %v1172_v43 }
 0x718   : > { %v1527_v45 = vpop.f32.mrf.mxu0 }
 0x719   : > { %v1406_v46 = vmul.f32 -1.702, %v1173_v44 }
 0x71a   : > { %v1175_v47 = vpop.f32.mrf.mxu0 }
 0x71b   : > { %v1180_v48 = vmul.f32 1.442695, %v1406_v46 }
 0x71c   : > { %v1528_v49 = vpop.f32.mrf.mxu0 }
 0x71d   : > { %1638 = vpow2.f32 %v1180_v48 }
 0x72a   : > { %v1639_v5 = vpop.eup %1638 }
 0x72b   : > { %v1182_v50 = vadd.f32 1.0, %v1639_v5 }
 0x72d   : > { %1640 = vrcp.f32 %v1182_v50 }
 0x73a   : > { %v1641_v51 = vpop.eup %1640 }
 0x73b   : > { %v1185_v52 = vmul.f32 %v1641_v51, %v1173_v44 }
 0x73d   : > { %v1186_v53 = vpack.c.bf16 %v1185_v52, %v1185_v52 }
 0x73f   : > { %1546 = vmatmul.mubr.bf16.vlgmr.msra.gmra.mxu1 %v1186_v53 }
 0x7ff   : > { %v1292_v55 = vpop.f32.mrf.mxu1 }
 0x800   : > { %v1293_v56 = vadd.f32 %v1407_v54, %v1292_v55 }
 0x801   : > { %v1547_v57 = vpop.f32.mrf.mxu1 }
 0x802   : > { %v1298_v58 = vadd.f32 %v1293_v56, %v1955_v11 }
 0x803   : > { %v1295_v59 = vpop.f32.mrf.mxu1 }
 0x804   : > { %1299 = vst.msk [vmem:[%s431_s22] sm:$0xff] %vm440_vm0, %v1298_v58 }
 0x805   : > { %v1548_v60 = vpop.f32.mrf.mxu1 }
 0x806   : > { %1655 = shalt.err (!%p1652_p3)
}
 0x807   : > { %s1656_s21 = scalar_lea.hbm %s2020_s1, 128  ;;  %s1660_s24 = scalar_lea.hbm %s2075_s13, 256 }
 0x808   : > { %p1657_p4 = scmp.ne.s32.totalorder %s2020_s1, %s1656_s21  ;;  %p1661_p9 = scmp.lt.s32.totalorder %s2020_s1, %s2075_s13 }
 0x809   : > { %p1662_p10 = scmp.lt.s32.totalorder %s1660_s24, %s1656_s21 }
 0x80a   : > { %p1658_p7 = pnand %p1657_p4, %p1829_p5 }
 0x80b   : > { %p1663_p11 = por %p1662_p10, %p1661_p9 }
 0x80c   : > { %p1659_p8 = pneg %p1658_p7 }
 0x80e   : > { %p1664_p12 = pnand %p1663_p11, %p1659_p8 }
 0x810   : > { %1667 = shalt.err (!%p1664_p12)
}
 0x811   : > { %1549 = dma.vmem_to_hbm [thread:$0]  (%p1829_p5), %s2022_s23, 128, %s2020_s1, %s1301_s29  }
 0x812 PF: > { %p1555_p13 = scmp.ge.s32.totalorder %s1702_s28, 2  ;;  %s1326_s15 = sand.u32 1, %s1690_s25  }
 0x813   : > { %s1327_s2 = scalar_lea.sflag [#allocation4], %s1326_s15 }
 0x814   : > { %p1552_p0 = pnand %p1555_p13, %p1833_p6 }
 0x816   : > { %p1553_p1 = pneg %p1552_p0 }
 0x818   : > { %1685 = dma.done.wait (%p1553_p1), %s1327_s2, 128  }
 0x819   : > { %1687 = vsyncadd (%p1553_p1), %s1327_s2, 4294967168  ;;  %p23_p2 = scmp.ge.s32.totalorder %s1816_s14, 4   ;;  %s2084_s25 = smov %s1694_s26 }
 0x81a   : > { %s2085_s26 = smov %s1698_s27  ;;  %s2086_s27 = smov %s1827_s17 }
 0x81b   : > { %s2087_s28 = smov %s1816_s14  ;;  %25 = sbr.rel (!%p23_p2) target bundleno = 7 (0x7), region = 107 }
 0x820   :  { %1332 = vsyncpa [#allocation4], 1 }
 0x821   :  { %1334 = vsyncpa [#allocation4 + $0x1], 1 }

// kernel: tpu_custom_call.1
= control target key start
LH: loop header
LB: loop body
LE: loop exit
PB: predicated region body
PF: predicated region fallthrough
CT: control target
= control target key end

     0   :  { %s2062_s0 = inlined_call_operand.vmem [shape: f32[2,8,32], index: 0, kind: input, shape index: {}]   ;;  %s2063_s1 = inlined_call_operand.vmem [shape: bf16[32,96], index: 1, kind: input, shape index: {}]   ;;  %s2064_s2 = inlined_call_operand.vmem [shape: f32[1,96], index: 2, kind: input, shape index: {}]   ;;  %s2065_s3 = inlined_call_operand.vmem [shape: bf16[32,32], index: 3, kind: input, shape index: {}]   ;;  %s2066_s4 = inlined_call_operand.vmem [shape: f32[1,32], index: 4, kind: input, shape index: {}]   ;;  %s2067_s5 = inlined_call_operand.vmem [shape: f32[1,32], index: 5, kind: input, shape index: {}]   ;;  %s2068_s6 = inlined_call_operand.vmem [shape: f32[1,32], index: 6, kind: input, shape index: {}]   ;;  %s2069_s7 = inlined_call_operand.vmem [shape: f32[1,32], index: 7, kind: input, shape index: {}]   ;;  %s2070_s8 = inlined_call_operand.vmem [shape: f32[1,32], index: 8, kind: input, shape index: {}]   ;;  %s2071_s9 = inlined_call_operand.vmem [shape: bf16[32,128], index: 9, kind: input, shape index: {}]   ;;  %s2072_s10 = inlined_call_operand.vmem [shape: f32[1,128], index: 10, kind: input, shape index: {}]   ;;  %s2073_s11 = inlined_call_operand.vmem [shape: bf16[128,32], index: 11, kind: input, shape index: {}]   ;;  %s2074_s12 = inlined_call_operand.vmem [shape: f32[1,32], index: 12, kind: input, shape index: {}]   ;;  %s2075_s13 = inlined_call_operand.hbm [shape: f32[2,8,32], index: 13, kind: output, shape index: {}]  }
   0x1   :  { %2076 = sst [smem:[#allocation6_spill]] %s2062_s0 }
   0x2   :  { %2077 = sst [smem:[#allocation7_spill]] %s2063_s1 }
   0x3   :  { %2078 = sst [smem:[#allocation8_spill]] %s2064_s2 }
   0x4   :  { %18 = vsyncpa [#allocation4], 0 }
   0x5   :  { %20 = vsyncpa [#allocation4 + $0x1], 0  ;;  %s1791_s25 = smov 0   ;;  %s1793_s26 = smov 0  }
   0x6   :  { %s1795_s27 = smov 0   ;;  %s1797_s28 = smov 0  }
   0x7 LB: > { %s1812_s29 = sadd.s32 4294967295, %s1702_s28   ;;  %s1373_s30 = sadd.s32 4294967294, %s1702_s28   ;;  %s1702_s28 = sphi %s1797_s28, %s2087_s28   ;;  %s1698_s27 = sphi %s1795_s27, %s2086_s27   ;;  %s1694_s26 = sphi %s1793_s26, %s2085_s26   ;;  %s1690_s25 = sphi %s1791_s25, %s2084_s25  }
   0x8   : > { %s1816_s14 = sadd.s32 1, %s1702_s28   ;;  %s311_s15 = sadd.s32 1, %s1698_s27 }
   0x9   : > { %s308_s16 = ssub.s32 %s1702_s28, %s1816_s14  ;;  %p321_p0 = scmp.ne.s32.totalorder %s1698_s27, %s1694_s26 }
   0xa   : > { %p309_p1 = scmp.eq.s32.totalorder %s308_s16, 0  ;;  %p322_p2 = scmp.eq.s32.totalorder %s1812_s29, 1 }
   0xb   : > { %p327_p3 = scmp.ne.s32.totalorder %s1694_s26, %s1690_s25  ;;  %p328_p4 = scmp.eq.s32.totalorder %s1373_s30, 1 }
   0xc   : > { %s1827_s17 = scalar_select %p309_p1, %s1698_s27, %s311_s15  }
   0xd   : > { %p1829_p5 = por %p322_p2, %p321_p0  ;;  %p1833_p6 = por %p328_p4, %p327_p3 }
   0xe   : > { %p1376_p7 = scmp.ge.s32.totalorder %s1702_s28, 1  ;;  %p389_p8 = scmp.lt.s32.totalorder %s1702_s28, 3 }
  0x10   : > { %p390_p9 = pnand %p1376_p7, %p389_p8 }
  0x11   : > { %p432_p10 = scmp.lt.s32.totalorder (!%p390_p9), %s1812_s29, 1  ;;  %s2081_s0 = sld [smem:[#allocation6_spill]] (!%p390_p9) }
  0x12   : > { %393 = sbr.rel (%p390_p9) target bundleno = 2066 (0x812), region = 72  ;;  %s2082_s1 = sld [smem:[#allocation7_spill]] (!%p390_p9) }
  0x13   : > { %s2083_s2 = sld [smem:[#allocation8_spill]] (!%p390_p9)  ;;  %s1706_s16 = smov (!%p390_p9), 120  }
  0x14   : > { %s1709_s22 = smov (!%p390_p9), 80   ;;  %s1710_s23 = smov (!%p390_p9), 112  }
  0x15   : > { %s1712_s30 = smov (!%p390_p9), 104   ;;  %s1713_s15 = smov (!%p390_p9), 64  }
  0x17   : > { %s433_s20 = scalar_select %p432_p10, %s1812_s29, 1  ;;  %vm440_vm0 = vcmask 261120   ;;  %v1704_v5 = vmov 0.0   ;;  %vm1705_vm1 = vmmov 0   ;;  %v1379_v17 = vld [vmem:[%s2067_s5] ss:$0 sm:$0xff] }
  0x18   : > { %v1604_v4 = vld [vmem:[%s2082_s1 + $0x8] sm:$0xff]   ;;  %1457 = vmatprep.subr.bf16.mxu0 %v1704_v5  ;;  %1461 = vmatprep.mubr.msk.bf16.mxu0 %vm1705_vm1, %v1704_v5  ;;  %v1605_v6 = vld [vmem:[%s2082_s1] sm:$0xff]   ;;  %vm543_vm2 = vcmask 64512   ;;  %vm606_vm3 = vcmask 1043456   ;;  %vm652_vm4 = vcmask 60416   ;;  %vm771_vm5 = vcmask 126016  }
  0x19   : > { %s1378_s21 = sshll.u32 %s433_s20, 3  ;;  %1458 = vmatpush3.bf16.msra.mxu0 %v1604_v4  ;;  %1477 = vmatprep.subr.bf16.mxu1 %v1704_v5  ;;  %v1380_v19 = vld [vmem:[%s2068_s6] ss:$0 sm:$0xff]  ;;  %s1707_s20 = smov 96   ;;  %vm890_vm6 = vcmask 191616   ;;  %vm1009_vm7 = vcmask 257216  }
  0x1a   : > { %s435_s24 = scalar_lea.vmem %s2081_s0, %s1378_s21  ;;  %1459 = vmatprep.subr.bf16.mxu0 %v1704_v5  ;;  %1479 = vmatprep.mubr.msk.bf16.mxu1 %vm1705_vm1, %v1704_v5  ;;  %v1381_v23 = vld [vmem:[%s2083_s2] ss:$0 sm:$0xff]  ;;  %s1708_s21 = smov 88  }
  0x1b   : > { %v1844_v0 = vld [vmem:[%s435_s24] sm:$0xff]  ;;  %s1711_s24 = smov 72  }
  0x1c   : > { %v441_v1 = vsel %vm440_vm0, %v1844_v0, 0.0  ;;  %v446_v2 = vmul.f32 %v1844_v0, %v1844_v0 }
  0x1d   : > { %442 = vadd.xlane.f32.xlu0 %v441_v1  ;;  %1460 = vmatpush3.bf16.msra.mxu0 %v1605_v6 }
  0x1e   : > { %v447_v3 = vsel %vm440_vm0, %v446_v2, 0.0  ;;  %1465 = vmatprep.subr.bf16.mxu0 %v1704_v5 }
  0x21   : > { %448 = vadd.xlane.f32.xlu0 %v447_v3 }
  0xa6   : > { %v443_v7 = vpop.xlane.xlu0 %442 }
  0xa7   : > { %v445_v8 = vmul.f32 0.03125, %v443_v7 }
  0xa9   : > { %v451_v10 = vmul.f32 %v445_v8, %v445_v8  ;;  %v454_v15 = vsub.f32 %v1844_v0, %v445_v8 }
  0xaa   : > { %v449_v9 = vpop.xlane.xlu0 %448 }
  0xab   : > { %v450_v11 = vmul.f32 0.03125, %v449_v9 }
  0xad   : > { %v452_v12 = vsub.f32 %v450_v11, %v451_v10 }
  0xaf   : > { %v453_v13 = vmax.f32 %v452_v12, 0.0 }
  0xb1   : > { %v455_v14 = vadd.f32 1e-05, %v453_v13 }
  0xb3   : > { %1618 = vrsqrt.f32 %v455_v14 }
  0xc0   : > { %v1619_v16 = vpop.eup %1618 }
  0xc1   : > { %v457_v18 = vmul.f32 %v1619_v16, %v454_v15 }
  0xc3   : > { %v464_v20 = vmul.f32 %v1379_v17, %v457_v18 }
  0xc5   : > { %v471_v21 = vadd.f32 %v1380_v19, %v464_v20 }
  0xc7   : > { %v472_v22 = vpack.c.bf16 %v471_v21, %v471_v21 }
  0xc9   : > { %1462 = vmatmul.mubr.msk.bf16.vlgmr.msra.gmra.mxu0 %vm440_vm0, %v472_v22 }
  0xca   : > { %1467 = vmatprep.mubr.msk.bf16.mxu0 %vm1705_vm1, %v1704_v5 }
 0x189   : > { %v533_v24 = vpop.f32.mrf.mxu0 }
 0x18a   : > { %v534_v25 = vadd.f32 %v1381_v23, %v533_v24 }
 0x18b   : > { %v1463_v26 = vpop.f32.mrf.mxu0 }
 0x18c   : > { %v1878_v27 = vpack.c.bf16 %v534_v25, %v534_v25 }
 0x18d   : > { %v536_v28 = vpop.f32.mrf.mxu0 }
 0x18e   : > { %654 = vrot.lane.b32.xlu0 %v1878_v27, %s1706_s16  ;;  %541 = vrot.lane.b32.xlu1 %v1878_v27, %s1707_s20  ;;  %s1714_s16 = smov 56   ;;  %s1715_s20 = smov 48  }
 0x18f   : > { %v1464_v29 = vpop.f32.mrf.mxu0 }
 0x192   : > { %656 = vrot.lane.b32.xlu1 %v1878_v27, %s1708_s21  ;;  %s1716_s21 = smov 40  }
 0x196   : > { %775 = vrot.lane.b32.xlu1 %v1878_v27, %s1709_s22  ;;  %s1717_s22 = smov 8  }
 0x19a   : > { %773 = vrot.lane.b32.xlu1 %v1878_v27, %s1710_s23 }
 0x19e   : > { %894 = vrot.lane.b32.xlu1 %v1878_v27, %s1711_s24 }
 0x1a2   : > { %892 = vrot.lane.b32.xlu1 %v1878_v27, %s1712_s30  ;;  %s429_s30 = sand.u32 1, %s1694_s26  }
 0x200   : > { %v542_v30 = vpop.permute.xlu1 %541  ;;  %v655_v35 = vpop.permute.xlu0 %654 }
 0x201   : > { %v548_v31 = vsel %vm543_vm2, %v542_v30, 0 }
 0x202   : > { %1466 = vmatpush3.bf16.xpose.msra.mxu0 %v548_v31 }
 0x203   : > { %1471 = vmatprep.subr.bf16.mxu0 %v1704_v5 }
 0x204   : > { %v657_v32 = vpop.permute.xlu1 %656 }
 0x205   : > { %v662_v33 = vsel %vm543_vm2, %v657_v32, 0 }
 0x206   : > { %1478 = vmatpush3.bf16.xpose.msra.mxu1 %v662_v33 }
 0x207   : > { %1489 = vmatprep.subr.bf16.mxu1 %v1704_v5 }
 0x208   : > { %v776_v34 = vpop.permute.xlu1 %775 }
 0x209   : > { %1468 = vmatmul.mubr.msk.bf16.vlgmr.msra.gmra.mxu0 %vm543_vm2, %v1878_v27  ;;  %v781_v37 = vsel %vm543_vm2, %v776_v34, 0 }
 0x20a   : > { %1473 = vmatprep.mubr.msk.bf16.mxu0 %vm1705_vm1, %v1704_v5 }
 0x20c   : > { %v774_v36 = vpop.permute.xlu1 %773 }
 0x20d   : > { %1480 = vmatmul.mubr.msk.bf16.vlgmr.msra.gmra.mxu1 %vm543_vm2, %v655_v35 }
 0x20e   : > { %1490 = vmatpush3.bf16.xpose.msra.mxu1 %v781_v37  ;;  %1491 = vmatprep.mubr.msk.bf16.mxu1 %vm1705_vm1, %v1704_v5 }
 0x20f   : > { %1501 = vmatprep.subr.bf16.mxu1 %v1704_v5 }
 0x210   : > { %v895_v38 = vpop.permute.xlu1 %894 }
 0x211   : > { %v900_v39 = vsel %vm543_vm2, %v895_v38, 0 }
 0x214   : > { %v893_v40 = vpop.permute.xlu1 %892 }
 0x215   : > { %1492 = vmatmul.mubr.msk.bf16.vlgmr.msra.gmra.mxu1 %vm543_vm2, %v774_v36 }
 0x216   : > { %1502 = vmatpush3.bf16.xpose.msra.mxu1 %v900_v39  ;;  %1503 = vmatprep.mubr.msk.bf16.mxu1 %vm1705_vm1, %v1704_v5 }
 0x217   : > { %1513 = vmatprep.subr.bf16.mxu1 %v1704_v5 }
 0x21d   : > { %1504 = vmatmul.mubr.msk.bf16.vlgmr.msra.gmra.mxu1 %vm543_vm2, %v893_v40 }
 0x21e   : > { %1517 = vmatprep.mubr.msk.bf16.mxu1 %vm1705_vm1, %v1704_v5 }
 0x2c9   : > { %v584_v41 = vpop.f32.mrf.mxu0 }
 0x2ca   : > { %v590_v42 = vsel %vm543_vm2, %v584_v41, -inf }
 0x2cb   : > { %591 = vmax.xlane.f32.xlu1 %v590_v42  ;;  %v1469_v43 = vpop.f32.mrf.mxu0 }
 0x2cd   : > { %v587_v44 = vpop.f32.mrf.mxu0  ;;  %v698_v45 = vpop.f32.mrf.mxu1 }
 0x2ce   : > { %v704_v46 = vsel %vm543_vm2, %v698_v45, -inf }
 0x2cf   : > { %705 = vmax.xlane.f32.xlu0 %v704_v46  ;;  %v1470_v47 = vpop.f32.mrf.mxu0  ;;  %v1481_v48 = vpop.f32.mrf.mxu1 }
 0x2d1   : > { %v701_v49 = vpop.f32.mrf.mxu1 }
 0x2d3   : > { %v1482_v50 = vpop.f32.mrf.mxu1 }
 0x2d5   : > { %v817_v51 = vpop.f32.mrf.mxu1 }
 0x2d6   : > { %v823_v60 = vsel %vm543_vm2, %v817_v51, -inf }
 0x2d7   : > { %v1493_v52 = vpop.f32.mrf.mxu1 }
 0x2d9   : > { %v820_v53 = vpop.f32.mrf.mxu1 }
 0x2db   : > { %v1494_v54 = vpop.f32.mrf.mxu1 }
 0x2dc   : > { %601 = vrot.lane.b32.xlu1 %v1878_v27, %s1713_s15  ;;  %v1607_v54 = vld [vmem:[%s2065_s3] sm:$0xff]   ;;  %s1377_s15 = sshll.u32 %s429_s30, 3 }
 0x2dd   : > { %v936_v55 = vpop.f32.mrf.mxu1 }
 0x2de   : > { %v942_v56 = vsel %vm543_vm2, %v936_v55, -inf }
 0x2df   : > { %943 = vmax.xlane.f32.xlu0 %v942_v56  ;;  %v1505_v57 = vpop.f32.mrf.mxu1 }
 0x2e1   : > { %v939_v58 = vpop.f32.mrf.mxu1 }
 0x2e3   : > { %v1506_v59 = vpop.f32.mrf.mxu1 }
 0x2f5   : > { %715 = vrot.lane.b32.xlu0 %v1878_v27, %s1714_s16  ;;  %s1718_s16 = smov 16  }
 0x300   : > { %824 = vmax.xlane.f32.xlu1 %v823_v60 }
 0x311   : > { %834 = vrot.lane.b32.xlu1 %v1878_v27, %s1715_s20  ;;  %s1719_s20 = smov 24  }
 0x315   : > { %953 = vrot.lane.b32.xlu1 %v1878_v27, %s1716_s21  ;;  %s1417_s21 = sshll.u32 %s1812_s29, 7  ;;  %s1301_s29 = scalar_lea.sflag [#allocation4], %s429_s30 }
 0x316   : > { %s2020_s1 = scalar_lea.hbm %s2075_s13, %s1417_s21 }
 0x354   : > { %v592_v61 = vpop.xlane.xlu1 %591 }
 0x355   : > { %v593_v62 = vsub.f32 %v584_v41, %v592_v61 }
 0x357   : > { %v594_v63 = vmul.f32 1.442695, %v593_v62 }
 0x358   : > { %v706_v1 = vpop.xlane.xlu0 %705  ;;  %v602_v2 = vpop.permute.xlu1 %601 }
 0x359   : > { %1620 = vpow2.f32 %v594_v63  ;;  %v707_v3 = vsub.f32 %v698_v45, %v706_v1  ;;  %v608_v4 = vsel %vm606_vm3, %v602_v2, 0 }
 0x35a   : > { %1472 = vmatpush3.bf16.msra.mxu0 %v608_v4 }
 0x35b   : > { %v708_v6 = vmul.f32 1.442695, %v707_v3  ;;  %1483 = vmatprep.subr.bf16.mxu0 %v1704_v5 }
 0x35d   : > { %1622 = vpow2.f32 %v708_v6 }
 0x366   : > { %v1621_v7 = vpop.eup %1620 }
 0x367   : > { %v600_v8 = vpack.c.bf16 %v1621_v7, %v1621_v7  ;;  %v596_v19 = vsel %vm543_vm2, %v1621_v7, 0.0  ;;  %v1396_v7 = vld [vmem:[%s2066_s4] ss:$0 sm:$0xff] }
 0x368   : > { %v944_v9 = vpop.xlane.xlu0 %943 }
 0x369   : > { %v945_v10 = vsub.f32 %v936_v55, %v944_v9  ;;  %1474 = vmatmul.mubr.msk.bf16.vlgmr.msra.gmra.mxu0 %vm543_vm2, %v600_v8 }
 0x36a   : > { %v1623_v11 = vpop.eup %1622  ;;  %1485 = vmatprep.mubr.msk.bf16.mxu0 %vm1705_vm1, %v1704_v5 }
 0x36b   : > { %v946_v12 = vmul.f32 1.442695, %v945_v10  ;;  %v710_v13 = vsel %vm543_vm2, %v1623_v11, 0.0  ;;  %v714_v16 = vpack.c.bf16 %v1623_v11, %v1623_v11 }
 0x36c   : > { %711 = vadd.xlane.f32.xlu0 %v710_v13  ;;  %v716_v14 = vpop.permute.xlu0 %715 }
 0x36d   : > { %1624 = vpow2.f32 %v946_v12  ;;  %v721_v15 = vsel %vm606_vm3, %v716_v14, 0 }
 0x36e   : > { %1484 = vmatpush3.bf16.msra.mxu0 %v721_v15 }
 0x36f   : > { %1495 = vmatprep.subr.bf16.mxu0 %v1704_v5 }
 0x371   : > { %1486 = vmatmul.mubr.msk.bf16.vlgmr.msra.gmra.mxu0 %vm543_vm2, %v714_v16 }
 0x372   : > { %1497 = vmatprep.mubr.msk.bf16.mxu0 %vm1705_vm1, %v1704_v5 }
 0x37a   : > { %v1625_v17 = vpop.eup %1624 }
 0x37b   : > { %v948_v18 = vsel %vm543_vm2, %v1625_v17, 0.0  ;;  %v952_v30 = vpack.c.bf16 %v1625_v17, %v1625_v17  ;;  %v1608_v17 = vld [vmem:[%s2071_s9 + $0x8] sm:$0xff]  }
 0x37c   : > { %949 = vadd.xlane.f32.xlu0 %v948_v18 }
 0x380   : > { %597 = vadd.xlane.f32.xlu0 %v596_v19 }
 0x389   : > { %v825_v20 = vpop.xlane.xlu1 %824 }
 0x38a   : > { %v826_v21 = vsub.f32 %v817_v51, %v825_v20  ;;  %v1606_v51 = vld [vmem:[%s2065_s3 + $0x8] sm:$0xff]  }
 0x38b   : > { %1514 = vmatpush3.bf16.msra.mxu1 %v1606_v51 }
 0x38c   : > { %v827_v22 = vmul.f32 1.442695, %v826_v21  ;;  %1515 = vmatprep.subr.bf16.mxu1 %v1704_v5 }
 0x38d   : > { %v835_v23 = vpop.permute.xlu1 %834 }
 0x38e   : > { %1626 = vpow2.f32 %v827_v22  ;;  %v840_v24 = vsel %vm606_vm3, %v835_v23, 0 }
 0x38f   : > { %1496 = vmatpush3.bf16.msra.mxu0 %v840_v24  ;;  %1516 = vmatpush3.bf16.msra.mxu1 %v1607_v54  ;;  %v1407_v54 = vld [vmem:[%s2074_s12] ss:$0 sm:$0xff] }
 0x390   : > { %1507 = vmatprep.subr.bf16.mxu0 %v1704_v5  ;;  %1529 = vmatprep.subr.bf16.mxu1 %v1704_v5 }
 0x391   : > { %v954_v26 = vpop.permute.xlu1 %953 }
 0x392   : > { %v959_v29 = vsel %vm606_vm3, %v954_v26, 0 }
 0x39b   : > { %v1627_v25 = vpop.eup %1626 }
 0x39c   : > { %v829_v27 = vsel %vm543_vm2, %v1627_v25, 0.0  ;;  %v833_v28 = vpack.c.bf16 %v1627_v25, %v1627_v25 }
 0x39d   : > { %830 = vadd.xlane.f32.xlu1 %v829_v27 }
 0x39e   : > { %1498 = vmatmul.mubr.msk.bf16.vlgmr.msra.gmra.mxu0 %vm543_vm2, %v833_v28  ;;  %v1400_v28 = vld [vmem:[%s2069_s7] ss:$0 sm:$0xff] }
 0x39f   : > { %1508 = vmatpush3.bf16.msra.mxu0 %v959_v29  ;;  %1509 = vmatprep.mubr.msk.bf16.mxu0 %vm1705_vm1, %v1704_v5 }
 0x3a0   : > { %1521 = vmatprep.subr.bf16.mxu0 %v1704_v5 }
 0x3a6   : > { %1510 = vmatmul.mubr.msk.bf16.vlgmr.msra.gmra.mxu0 %vm543_vm2, %v952_v30  ;;  %v1401_v30 = vld [vmem:[%s2070_s8] ss:$0 sm:$0xff] }
 0x3a7   : > { %1525 = vmatprep.mubr.msk.bf16.mxu0 %vm1705_vm1, %v1704_v5  ;;  %1522 = vmatpush3.bf16.msra.mxu0 %v1608_v17 }
 0x3a8   : > { %1523 = vmatprep.subr.bf16.mxu0 %v1704_v5 }
 0x3f5   : > { %v712_v31 = vpop.xlane.xlu0 %711 }
 0x405   : > { %v950_v32 = vpop.xlane.xlu0 %949 }
 0x409   : > { %v598_v33 = vpop.xlane.xlu0 %597 }
 0x40a   : > { %1628 = vrcp.f32 %v598_v33 }
 0x40b   : > { %1630 = vrcp.f32 %v712_v31 }
 0x417   : > { %v1629_v34 = vpop.eup %1628 }
 0x418   : > { %v1631_v41 = vpop.eup %1630 }
 0x426   : > { %v831_v48 = vpop.xlane.xlu1 %830 }
 0x427   : > { %1632 = vrcp.f32 %v831_v48 }
 0x428   : > { %1634 = vrcp.f32 %v950_v32 }
 0x429   : > { %v644_v35 = vpop.f32.mrf.mxu0 }
 0x42a   : > { %v650_v36 = vmul.f32 %v1629_v34, %v644_v35  ;;  %v1610_v34 = vld [vmem:[%s2073_s11 + $0x38] sm:$0xff]   ;;  %v1611_v35 = vld [vmem:[%s2073_s11 + $0x30] sm:$0xff]  }
 0x42b   : > { %v1475_v37 = vpop.f32.mrf.mxu0 }
 0x42c   : > { %v651_v38 = vpack.c.bf16 %v650_v36, %v650_v36  ;;  %v1612_v36 = vld [vmem:[%s2073_s11 + $0x28] sm:$0xff]   ;;  %v1613_v37 = vld [vmem:[%s2073_s11 + $0x20] sm:$0xff]  }
 0x42d   : > { %v647_v39 = vpop.f32.mrf.mxu0 }
 0x42e   : > { %653 = vst.msk [vmem:[#allocation2] sm:$0xf] %vm652_vm4, %v651_v38  ;;  %v1614_v38 = vld [vmem:[%s2073_s11 + $0x18] sm:$0xff]   ;;  %v1615_v39 = vld [vmem:[%s2073_s11 + $0x10] sm:$0xff]  }
 0x42f   : > { %v1476_v40 = vpop.f32.mrf.mxu0 }
 0x430   : > { %v1616_v40 = vld [vmem:[%s2073_s11 + $0x8] sm:$0xff]  }
 0x431   : > { %v757_v42 = vpop.f32.mrf.mxu0 }
 0x432   : > { %v763_v43 = vmul.f32 %v1631_v41, %v757_v42  ;;  %v1617_v41 = vld [vmem:[%s2073_s11] sm:$0xff]  }
 0x433   : > { %v1487_v44 = vpop.f32.mrf.mxu0  ;;  %v1402_v42 = vld [vmem:[%s2072_s10] ss:$0 sm:$0xff] }
 0x434   : > { %v1420_v45 = vpack.c.bf16 %v763_v43, %v763_v43  ;;  %v1633_v49 = vpop.eup %1632 }
 0x435   : > { %v760_v46 = vpop.f32.mrf.mxu0  ;;  %v1635_v58 = vpop.eup %1634 }
 0x436   : > { %768 = vrot.lane.b32.xlu1 %v1420_v45, %s1717_s22  ;;  %s431_s22 = scalar_lea.vmem [#allocation3], %s1377_s15 }
 0x437   : > { %v1488_v47 = vpop.f32.mrf.mxu0  ;;  %s1314_s23 = sshll.u32 %s431_s22, 4  ;;  %s2022_s23 = int_to_ptr.vmem [resolvable:$true] %s1314_s23 }
 0x438   : > { %s1642_s15 = scalar_lea.vmem %s2022_s23, 128 }
 0x439   : > { %p1643_p11 = scmp.ne.s32.totalorder %s2022_s23, %s1642_s15 }
 0x43b   : > { %p1644_p12 = pnand %p1643_p11, %p1829_p5 }
 0x43d   : > { %p1645_p13 = pneg %p1644_p12 }
 0x45e   : > { %v876_v50 = vpop.f32.mrf.mxu0 }
 0x45f   : > { %v882_v52 = vmul.f32 %v1633_v49, %v876_v50 }
 0x460   : > { %v1499_v53 = vpop.f32.mrf.mxu0 }
 0x461   : > { %v1421_v55 = vpack.c.bf16 %v882_v52, %v882_v52 }
 0x462   : > { %v879_v56 = vpop.f32.mrf.mxu0 }
 0x463   : > { %887 = vrot.lane.b32.xlu0 %v1421_v55, %s1718_s16  ;;  %s1720_s16 = smov [#allocation3]  }
 0x464   : > { %v1500_v57 = vpop.f32.mrf.mxu0 }
 0x466   : > { %v995_v59 = vpop.f32.mrf.mxu0 }
 0x467   : > { %v1001_v60 = vmul.f32 %v1635_v58, %v995_v59 }
 0x468   : > { %v1511_v61 = vpop.f32.mrf.mxu0 }
 0x469   : > { %v1422_v62 = vpack.c.bf16 %v1001_v60, %v1001_v60 }
 0x46a   : > { %v998_v63 = vpop.f32.mrf.mxu0 }
 0x46b   : > { %1006 = vrot.lane.b32.xlu1 %v1422_v62, %s1719_s20  ;;  %s1646_s20 = sshll.u32 %s1720_s16, 4  ;;  %s1647_s20 = int_to_ptr.vmem [resolvable:$false] %s1646_s20 }
 0x46c   : > { %v1512_v1 = vpop.f32.mrf.mxu0  ;;  %s1648_s0 = scalar_lea.vmem %s1647_s20, 256  ;;  %p1649_p0 = scmp.lt.s32.totalorder %s2022_s23, %s1647_s20 }
 0x46d   : > { %p1650_p1 = scmp.lt.s32.totalorder %s1648_s0, %s1642_s15 }
 0x46f   : > { %p1651_p2 = por %p1650_p1, %p1649_p0 }
 0x471   : > { %p1652_p3 = pnand %p1651_p2, %p1645_p13 }
 0x4a8   : > { %v769_v2 = vpop.permute.xlu1 %768 }
 0x4a9   : > { %772 = vst.msk [vmem:[#allocation2] sm:$0xf] %vm771_vm5, %v769_v2 }
 0x4d5   : > { %v888_v3 = vpop.permute.xlu0 %887 }
 0x4d6   : > { %891 = vst.msk [vmem:[#allocation2] sm:$0xf] %vm890_vm6, %v888_v3 }
 0x4dd   : > { %v1007_v4 = vpop.permute.xlu1 %1006 }
 0x4de   : > { %1010 = vst.msk [vmem:[#allocation2] sm:$0xf] %vm1009_vm7, %v1007_v4 }
 0x4e5   : > { %v1011_v6 = vld [vmem:[#allocation2] sm:$0xf] }
 0x4e6   : > { %1518 = vmatmul.mubr.msk.bf16.vlgmr.msra.gmra.mxu1 %vm440_vm0, %v1011_v6 }
 0x4e7   : > { %1545 = vmatprep.mubr.msk.bf16.mxu1 %vm1705_vm1, %v1704_v5  ;;  %1530 = vmatpush3.bf16.msra.mxu1 %v1610_v34 }
 0x4e8   : > { %1531 = vmatprep.subr.bf16.mxu1 %v1704_v5 }
 0x4eb   : > { %1532 = vmatpush3.bf16.msra.mxu1 %v1611_v35 }
 0x4ec   : > { %1533 = vmatprep.subr.bf16.mxu1 %v1704_v5 }
 0x4ef   : > { %1534 = vmatpush3.bf16.msra.mxu1 %v1612_v36 }
 0x4f0   : > { %1535 = vmatprep.subr.bf16.mxu1 %v1704_v5 }
 0x4f3   : > { %1536 = vmatpush3.bf16.msra.mxu1 %v1613_v37 }
 0x4f4   : > { %1537 = vmatprep.subr.bf16.mxu1 %v1704_v5 }
 0x4f7   : > { %1538 = vmatpush3.bf16.msra.mxu1 %v1614_v38 }
 0x4f8   : > { %1539 = vmatprep.subr.bf16.mxu1 %v1704_v5 }
 0x4fb   : > { %1540 = vmatpush3.bf16.msra.mxu1 %v1615_v39 }
 0x4fc   : > { %1541 = vmatprep.subr.bf16.mxu1 %v1704_v5 }
 0x4ff   : > { %1542 = vmatpush3.bf16.msra.mxu1 %v1616_v40 }
 0x500   : > { %1543 = vmatprep.subr.bf16.mxu1 %v1704_v5 }
 0x503   : > { %1544 = vmatpush3.bf16.msra.mxu1 %v1617_v41 }
 0x5a6   : > { %v1072_v8 = vpop.f32.mrf.mxu1 }
 0x5a7   : > { %v1073_v9 = vadd.f32 %v1396_v7, %v1072_v8 }
 0x5a8   : > { %v1519_v10 = vpop.f32.mrf.mxu1 }
 0x5a9   : > { %v1955_v11 = vadd.f32 %v1073_v9, %v1844_v0  ;;  %v1609_v0 = vld [vmem:[%s2071_s9] sm:$0xff]  }
 0x5aa   : > { %v1075_v12 = vpop.f32.mrf.mxu1  ;;  %1524 = vmatpush3.bf16.msra.mxu0 %v1609_v0 }
 0x5ab   : > { %v1081_v13 = vsel %vm440_vm0, %v1955_v11, 0.0  ;;  %v1085_v14 = vmul.f32 %v1955_v11, %v1955_v11 }
 0x5ac   : > { %1082 = vadd.xlane.f32.xlu1 %v1081_v13  ;;  %v1520_v15 = vpop.f32.mrf.mxu1 }
 0x5ad   : > { %v1086_v16 = vsel %vm440_vm0, %v1085_v14, 0.0 }
 0x5ae   : > { %1087 = vadd.xlane.f32.xlu0 %v1086_v16 }
 0x635   : > { %v1083_v18 = vpop.xlane.xlu1 %1082 }
 0x636   : > { %v1084_v19 = vmul.f32 0.03125, %v1083_v18 }
 0x637   : > { %v1088_v20 = vpop.xlane.xlu0 %1087 }
 0x638   : > { %v1090_v21 = vmul.f32 %v1084_v19, %v1084_v19  ;;  %v1089_v22 = vmul.f32 0.03125, %v1088_v20  ;;  %v1093_v26 = vsub.f32 %v1955_v11, %v1084_v19 }
 0x63a   : > { %v1091_v23 = vsub.f32 %v1089_v22, %v1090_v21 }
 0x63c   : > { %v1092_v24 = vmax.f32 %v1091_v23, 0.0 }
 0x63e   : > { %v1094_v25 = vadd.f32 1e-05, %v1092_v24 }
 0x640   : > { %1636 = vrsqrt.f32 %v1094_v25 }
 0x64d   : > { %v1637_v27 = vpop.eup %1636 }
 0x64e   : > { %v1096_v29 = vmul.f32 %v1637_v27, %v1093_v26 }
 0x650   : > { %v1103_v31 = vmul.f32 %v1400_v28, %v1096_v29 }
 0x652   : > { %v1110_v32 = vadd.f32 %v1401_v30, %v1103_v31 }
 0x654   : > { %v1111_v33 = vpack.c.bf16 %v1110_v32, %v1110_v32 }
 0x656   : > { %1526 = vmatmul.mubr.msk.bf16.vlgmr.msra.gmra.mxu0 %vm440_vm0, %v1111_v33 }
 0x716   : > { %v1172_v43 = vpop.f32.mrf.mxu0 }
 0x717   : > { %v1173_v44 = vadd.f32 %v1402_v42, %v1172_v43 }
 0x718   : > { %v1527_v45 = vpop.f32.mrf.mxu0 }
 0x719   : > { %v1406_v46 = vmul.f32 -1.702, %v1173_v44 }
 0x71a   : > { %v1175_v47 = vpop.f32.mrf.mxu0 }
 0x71b   : > { %v1180_v48 = vmul.f32 1.442695, %v1406_v46 }
 0x71c   : > { %v1528_v49 = vpop.f32.mrf.mxu0 }
 0x71d   : > { %1638 = vpow2.f32 %v1180_v48 }
 0x72a   : > { %v1639_v5 = vpop.eup %1638 }
 0x72b   : > { %v1182_v50 = vadd.f32 1.0, %v1639_v5 }
 0x72d   : > { %1640 = vrcp.f32 %v1182_v50 }
 0x73a   : > { %v1641_v51 = vpop.eup %1640 }
 0x73b   : > { %v1185_v52 = vmul.f32 %v1641_v51, %v1173_v44 }
 0x73d   : > { %v1186_v53 = vpack.c.bf16 %v1185_v52, %v1185_v52 }
 0x73f   : > { %1546 = vmatmul.mubr.bf16.vlgmr.msra.gmra.mxu1 %v1186_v53 }
 0x7ff   : > { %v1292_v55 = vpop.f32.mrf.mxu1 }
 0x800   : > { %v1293_v56 = vadd.f32 %v1407_v54, %v1292_v55 }
 0x801   : > { %v1547_v57 = vpop.f32.mrf.mxu1 }
 0x802   : > { %v1298_v58 = vadd.f32 %v1293_v56, %v1955_v11 }
 0x803   : > { %v1295_v59 = vpop.f32.mrf.mxu1 }
 0x804   : > { %1299 = vst.msk [vmem:[%s431_s22] sm:$0xff] %vm440_vm0, %v1298_v58 }
 0x805   : > { %v1548_v60 = vpop.f32.mrf.mxu1 }
 0x806   : > { %1655 = shalt.err (!%p1652_p3)
}
 0x807   : > { %s1656_s21 = scalar_lea.hbm %s2020_s1, 128  ;;  %s1660_s24 = scalar_lea.hbm %s2075_s13, 256 }
 0x808   : > { %p1657_p4 = scmp.ne.s32.totalorder %s2020_s1, %s1656_s21  ;;  %p1661_p9 = scmp.lt.s32.totalorder %s2020_s1, %s2075_s13 }
 0x809   : > { %p1662_p10 = scmp.lt.s32.totalorder %s1660_s24, %s1656_s21 }
 0x80a   : > { %p1658_p7 = pnand %p1657_p4, %p1829_p5 }
 0x80b   : > { %p1663_p11 = por %p1662_p10, %p1661_p9 }
 0x80c   : > { %p1659_p8 = pneg %p1658_p7 }
 0x80e   : > { %p1664_p12 = pnand %p1663_p11, %p1659_p8 }
 0x810   : > { %1667 = shalt.err (!%p1664_p12)
}
 0x811   : > { %1549 = dma.vmem_to_hbm [thread:$0]  (%p1829_p5), %s2022_s23, 128, %s2020_s1, %s1301_s29  }
 0x812 PF: > { %p1555_p13 = scmp.ge.s32.totalorder %s1702_s28, 2  ;;  %s1326_s15 = sand.u32 1, %s1690_s25  }
 0x813   : > { %s1327_s2 = scalar_lea.sflag [#allocation4], %s1326_s15 }
 0x814   : > { %p1552_p0 = pnand %p1555_p13, %p1833_p6 }
 0x816   : > { %p1553_p1 = pneg %p1552_p0 }
 0x818   : > { %1685 = dma.done.wait (%p1553_p1), %s1327_s2, 128  }
 0x819   : > { %1687 = vsyncadd (%p1553_p1), %s1327_s2, 4294967168  ;;  %p23_p2 = scmp.ge.s32.totalorder %s1816_s14, 4   ;;  %s2084_s25 = smov %s1694_s26 }
 0x81a   : > { %s2085_s26 = smov %s1698_s27  ;;  %s2086_s27 = smov %s1827_s17 }
 0x81b   : > { %s2087_s28 = smov %s1816_s14  ;;  %25 = sbr.rel (!%p23_p2) target bundleno = 7 (0x7), region = 107 }
 0x820   :  { %1332 = vsyncpa [#allocation4], 1 }
 0x821   :  { %1334 = vsyncpa [#allocation4 + $0x1], 1 }

</bundles_post_ra>
